<compile_context>
chip_gen: v7x
topology: tpu7x:2x2x1
jax: 0.10.0
libtpu: 0.0.40
codegen_flags: <defaults>
</compile_context>

<pallas_src>
import jax
import jax.numpy as jnp
import numpy as np
from jax.experimental import pallas as pl
from jax.experimental.pallas import tpu as pltpu


def _scft_kernel(vs_ref, vr_ref, wq_ref, bq_ref, wk_ref, bk_ref, wv_ref, bv_ref,
                 o_ref, hkT_sc, hv_sc):
    qi = pl.program_id(1)

    # Key/value projections depend only on the batch element, not on the query
    # tile: compute once per batch element and cache in VMEM scratch (persists
    # across the inner, sequential query-tile axis).  h_k is stored transposed
    # once here so the per-tile energy matmul needs no XLU transpose.
    @pl.when(qi == 0)
    def _():
        vr = vr_ref[0]                                                  # (HW, C) bf16
        hk = jnp.dot(vr, wk_ref[...],
                     preferred_element_type=jnp.float32) + bk_ref[...]  # (HW, KP) f32
        hv = jnp.dot(vr, wv_ref[...],
                     preferred_element_type=jnp.float32) + bv_ref[...]  # (HW, C)  f32
        hkT_sc[...] = hk.T.astype(hkT_sc.dtype)                         # (KP, HW)
        hv_sc[...] = hv.astype(hv_sc.dtype)                             # (HW, C)

    vs = vs_ref[0]                                                      # (TQ, C) f32
    # Query projection; 1/sqrt(base) is pre-folded into wq/bq by the wrapper.
    hq = (jnp.dot(vs.astype(jnp.bfloat16), wq_ref[...],
                  preferred_element_type=jnp.float32)
          + bq_ref[...]).astype(jnp.bfloat16)                           # (TQ, KP)

    # energy = hq @ h_k^T  -- plain MXU matmul against the pre-transposed cache.
    energy = jnp.dot(hq, hkT_sc[...],
                     preferred_element_type=jnp.float32)                # (TQ, HW)

    # Row-wise stable softmax (== torch.nn.Softmax(dim=-1)); statistics in f32,
    # probabilities go straight to bf16 (max prob is exactly 1.0).
    m = jnp.max(energy, axis=-1, keepdims=True)
    p = jnp.exp(energy - m)                                             # (TQ, HW) f32
    inv_l = pl.reciprocal(jnp.sum(p, axis=-1, keepdims=True), approx=True)

    # Unnormalized (p @ h_v), then fold the softmax denominator into the small
    # (TQ, C) result instead of the (TQ, HW) probabilities.
    acc = jnp.dot(p.astype(jnp.bfloat16), hv_sc[...],
                  preferred_element_type=jnp.float32)                   # (TQ, C)
    o_ref[0] = (acc * inv_l + vs).astype(o_ref.dtype)


def _vmem_capacity_bytes():
    """Physical VMEM per core; conservative 64 MiB fallback if undetectable."""
    try:
        info = pltpu.get_tpu_info()
    except Exception:
        return 64 * 1024 * 1024
    for attr in ("vmem_capacity_bytes", "vmem_size_bytes", "vmem_bytes"):
        v = getattr(info, attr, None)
        if isinstance(v, (int, np.integer)) and int(v) > 0:
            return int(v)
    return 64 * 1024 * 1024


def _plan_tiles(hw_q, hw, c, kp, max_tq):
    """Pick (TQ, vmem_limit_bytes) from the per-generation VMEM budget."""
    cap = _vmem_capacity_bytes()
    if cap >= 128 * 1024 * 1024:
        vmem_limit = 100 * 1024 * 1024          # v5e / v6e class (128 MiB physical)
    else:
        vmem_limit = min(int(cap * 3 // 4), 52 * 1024 * 1024)   # v7x class (64 MiB)

    # Fixed residents (bytes), independent of TQ:
    #   vr block (bf16, double-buffered), hkT/hv scratch (bf16, single-buffered),
    #   weights/biases (double-buffered), compiler-internal slack.
    fixed = (2 * hw * c * 2
             + hw * kp * 2 + hw * c * 2
             + 2 * (2 * c * kp * 2 + 2 * kp * 4 + c * c * 2 + c * 4)
             + 2 * 1024 * 1024)
    # Per-query-row cost: f32 energy + f32 exp (+ headroom), bf16 copy of p,
    # double-buffered f32 vs input tile and f32 output tile, hq row.
    per_row = 3 * hw * 4 + hw * 2 + 4 * c * 4 + 4 * kp

    avail = vmem_limit - fixed
    if avail <= per_row * 16:
        tq_cap = 16
    else:
        tq_cap = (avail // per_row) // 16 * 16

    tq = int(min(max_tq, tq_cap, max(hw_q, 16)))
    tq = max(16, (tq // 16) * 16)               # bf16 sublane-pack friendly
    return tq, int(vmem_limit)


def scft_forward(vs_nchw, vr_nchw, params, base, *, max_tq=1024):
    """vs_nchw, vr_nchw: (B, C, H, W) float32; returns (B, C, H, W) float32."""
    B, C, H, W = vs_nchw.shape
    HW = H * W
    C8 = C // 8
    inv_scale = 1.0 / (float(base) ** 0.5)
    KP = ((C8 + 127) // 128) * 128              # lane-dense Q/K projection width

    # NCHW -> token-major (B, HW, C). vr only feeds MXU matmuls -> ship as bf16.
    vs = jnp.transpose(vs_nchw, (0, 2, 3, 1)).reshape(B, HW, C).astype(jnp.float32)
    vr = jnp.transpose(vr_nchw, (0, 2, 3, 1)).reshape(B, HW, C).astype(jnp.bfloat16)

    wq, bq, wk, bk, wv, bv = params             # wq/wk: (C, C8), wv: (C, C)

    # Fold 1/sqrt(base) into the query projection; zero-pad Q/K width to KP
    # (exact: padded columns contribute 0 to the energy dot products).
    wq_p = jnp.zeros((C, KP), jnp.float32).at[:, :C8].set(wq * inv_scale).astype(jnp.bfloat16)
    bq_p = jnp.zeros((1, KP), jnp.float32).at[:, :C8].set(bq * inv_scale)
    wk_p = jnp.zeros((C, KP), jnp.float32).at[:, :C8].set(wk).astype(jnp.bfloat16)
    bk_p = jnp.zeros((1, KP), jnp.float32).at[:, :C8].set(bk)
    wv_b = wv.astype(jnp.bfloat16)
    bv_f = bv.astype(jnp.float32)

    # Pseudo-batch split of the query axis: with B == 1 the "parallel" batch
    # axis would leave the second TensorCore of a dual-TC chip (v7x) idle, so
    # split queries into 2 halves (hk/hv recomputed per half -- cheap).
    qsplit = 2 if (B == 1 and HW >= 32) else 1
    HW_q = pl.cdiv(HW, qsplit)                  # queries per pseudo-batch

    TQ, vmem_limit = _plan_tiles(HW_q, HW, C, KP, max_tq)
    HW_q_pad = pl.cdiv(HW_q, TQ) * TQ
    total_q = qsplit * HW_q_pad                 # >= HW always
    nQ = HW_q_pad // TQ
    BQ = B * qsplit

    if total_q != HW:
        vs = jnp.pad(vs, ((0, 0), (0, total_q - HW), (0, 0)))
    vs = vs.reshape(BQ, HW_q_pad, C)
    if qsplit > 1:
        vr = jnp.repeat(vr, qsplit, axis=0)     # each query half sees all keys

    weight_spec = lambda shape: pl.BlockSpec(shape, lambda b, qi: (0, 0))

    out = pl.pallas_call(
        _scft_kernel,
        out_shape=jax.ShapeDtypeStruct((BQ, HW_q_pad, C), jnp.float32),
        grid_spec=pltpu.PrefetchScalarGridSpec(
            num_scalar_prefetch=0,
            grid=(BQ, nQ),
            in_specs=[
                pl.BlockSpec((1, TQ, C), lambda b, qi: (b, qi, 0)),   # vs query tile
                pl.BlockSpec((1, HW, C), lambda b, qi: (b, 0, 0)),    # vr (resident)
                weight_spec((C, KP)),                                 # Wq (padded, scaled)
                weight_spec((1, KP)),                                 # bq
                weight_spec((C, KP)),                                 # Wk (padded)
                weight_spec((1, KP)),                                 # bk
                weight_spec((C, C)),                                  # Wv
                weight_spec((1, C)),                                  # bv
            ],
            out_specs=pl.BlockSpec((1, TQ, C), lambda b, qi: (b, qi, 0)),
            scratch_shapes=[
                pltpu.VMEM((KP, HW), jnp.bfloat16),                   # cached h_k^T
                pltpu.VMEM((HW, C), jnp.bfloat16),                    # cached h_v
            ],
        ),
        compiler_params=pltpu.CompilerParams(
            # Batch axis shards across TensorCores; the query-tile axis MUST
            # stay sequential ("arbitrary") so the qi==0 scratch cache of
            # h_k^T / h_v is valid for qi > 0.
            dimension_semantics=("parallel", "arbitrary"),
            vmem_limit_bytes=vmem_limit,
        ),
    )(vs, vr, wq_p, bq_p, wk_p, bk_p, wv_b, bv_f)

    # (BQ, HW_q_pad, C) -> drop query padding -> NCHW
    out = out.reshape(B, total_q, C)[:, :HW, :]
    return jnp.transpose(out.reshape(B, H, W, C), (0, 3, 1, 2))


def scft_reference(vs_nchw, vr_nchw, params, base):
    """Pure-JAX f32 reference mirroring the PyTorch forward exactly."""
    B, C, H, W = vs_nchw.shape
    HW = H * W
    scale = float(base) ** 0.5
    wq, bq, wk, bk, wv, bv = params

    def conv1x1(x, w, b):  # x: (B, C, H, W), w: (Cin, Cout), b: (1, Cout)
        xf = jnp.transpose(x, (0, 2, 3, 1)).reshape(B, HW, C)
        y = jnp.einsum("bnc,co->bno", xf, w) + b[None]          # (B, HW, Cout)
        return jnp.transpose(y, (0, 2, 1))                       # (B, Cout, HW)

    h_q = jnp.transpose(conv1x1(vs_nchw, wq, bq), (0, 2, 1))     # (B, HW, C/8)
    h_k = conv1x1(vr_nchw, wk, bk)                               # (B, C/8, HW)
    energy = jnp.einsum("bnk,bkm->bnm", h_q, h_k) / scale        # (B, HW, HW)
    attention = jax.nn.softmax(energy, axis=-1)
    attention = jnp.transpose(attention, (0, 2, 1))
    h_v = conv1x1(vr_nchw, wv, bv)                               # (B, C, HW)
    h = jnp.einsum("bcm,bmn->bcn", h_v, attention)
    return h.reshape(B, C, H, W) + vs_nchw


if __name__ == "__main__":
    # Small shapes consistent with the module (channels divisible by 8).
    base = 128         # channel count (the module's `base`) -> lane-dense output
    B, C, H, W = 2, base, 16, 16
    C8 = C // 8

    key = jax.random.PRNGKey(0)
    k_vs, k_vr, k_wq, k_bq, k_wk, k_bk, k_wv, k_bv = jax.random.split(key, 8)

    vs = jax.random.normal(k_vs, (B, C, H, W), dtype=jnp.float32)
    vr = jax.random.normal(k_vr, (B, C, H, W), dtype=jnp.float32)

    # Deterministic synthetic parameters (1x1 conv weights expressed as matmuls).
    params = (
        jax.random.normal(k_wq, (C, C8), dtype=jnp.float32) * 0.05,   # Wq
        jax.random.normal(k_bq, (1, C8), dtype=jnp.float32) * 0.05,   # bq
        jax.random.normal(k_wk, (C, C8), dtype=jnp.float32) * 0.05,   # Wk
        jax.random.normal(k_bk, (1, C8), dtype=jnp.float32) * 0.05,   # bk
        jax.random.normal(k_wv, (C, C), dtype=jnp.float32) * 0.05,    # Wv
        jax.random.normal(k_bv, (1, C), dtype=jnp.float32) * 0.05,    # bv
    )

    # Tolerance loosened vs pure-f32: bf16 MXU inputs (f32 accumulation) and the
    # approximate EUP reciprocal in the softmax normalization.
    RTOL = ATOL = 2e-2

    # Case 1: B=2, forced small TQ -> exercises the multi-query-tile path and
    # the per-batch h_k^T / h_v scratch cache (batch axis "parallel").
    out = jax.block_until_ready(scft_forward(vs, vr, params, base, max_tq=64))
    ref = jax.block_until_ready(scft_reference(vs, vr, params, base))
    np.testing.assert_allclose(np.asarray(out), np.asarray(ref), rtol=RTOL, atol=ATOL)

    # Case 2: B=1, budget-driven TQ -> exercises the pseudo-batch query split
    # that keeps both TensorCores busy at batch size 1 (v7x).
    out1 = jax.block_until_ready(scft_forward(vs[:1], vr[:1], params, base))
    ref1 = jax.block_until_ready(scft_reference(vs[:1], vr[:1], params, base))
    np.testing.assert_allclose(np.asarray(out1), np.asarray(ref1), rtol=RTOL, atol=ATOL)

    print("KERNEL_OK")
</pallas_src>

<mosaic_0001>
module attributes {stable_mosaic.version = 11 : i64} {
  func.func @_scft_kernel(%arg0: i32, %arg1: i32, %arg2: memref<1x64x128xf32, #tpu.memory_space<vmem>>, %arg3: memref<1x256x128xbf16, #tpu.memory_space<vmem>>, %arg4: memref<128x128xbf16, #tpu.memory_space<vmem>>, %arg5: memref<1x128xf32, #tpu.memory_space<vmem>>, %arg6: memref<128x128xbf16, #tpu.memory_space<vmem>>, %arg7: memref<1x128xf32, #tpu.memory_space<vmem>>, %arg8: memref<128x128xbf16, #tpu.memory_space<vmem>>, %arg9: memref<1x128xf32, #tpu.memory_space<vmem>>, %arg10: memref<1x64x128xf32, #tpu.memory_space<vmem>>, %arg11: memref<128x256xbf16, #tpu.memory_space<vmem>>, %arg12: memref<256x128xbf16, #tpu.memory_space<vmem>>) attributes {dimension_semantics = [#tpu.dimension_semantics<parallel>, #tpu.dimension_semantics<arbitrary>], iteration_bounds = array<i64: 2, 4>, scalar_prefetch = 0 : i64, scratch_operands = 2 : i64, tpu.core_type = #tpu.core_type<tc>, window_params = [{transform_indices = @transform_0, window_bounds = array<i64: 1, 64, 128>}, {transform_indices = @transform_1, window_bounds = array<i64: 1, 256, 128>}, {pipeline_mode = #tpu.pipeline_mode<synchronous>, transform_indices = @transform_2, window_bounds = array<i64: 128, 128>}, {pipeline_mode = #tpu.pipeline_mode<synchronous>, transform_indices = @transform_3, window_bounds = array<i64: 1, 128>}, {pipeline_mode = #tpu.pipeline_mode<synchronous>, transform_indices = @transform_4, window_bounds = array<i64: 128, 128>}, {pipeline_mode = #tpu.pipeline_mode<synchronous>, transform_indices = @transform_5, window_bounds = array<i64: 1, 128>}, {pipeline_mode = #tpu.pipeline_mode<synchronous>, transform_indices = @transform_6, window_bounds = array<i64: 128, 128>}, {pipeline_mode = #tpu.pipeline_mode<synchronous>, transform_indices = @transform_7, window_bounds = array<i64: 1, 128>}, {transform_indices = @transform_8, window_bounds = array<i64: 1, 64, 128>}]} {
    %c0_i32 = arith.constant 0 : i32
    %0 = arith.cmpi eq, %arg1, %c0_i32 : i32
    %1 = arith.extui %0 : i1 to i32
    %c0_i32_0 = arith.constant 0 : i32
    %2 = arith.cmpi ne, %1, %c0_i32_0 : i32
    scf.if %2 {
      %c0_18 = arith.constant 0 : index
      %c0_19 = arith.constant 0 : index
      %c0_20 = arith.constant 0 : index
      %31 = vector.load %arg3[%c0_18, %c0_19, %c0_20] : memref<1x256x128xbf16, #tpu.memory_space<vmem>>, vector<1x256x128xbf16>
      %32 = vector.shape_cast %31 : vector<1x256x128xbf16> to vector<256x128xbf16>
      %c0_21 = arith.constant 0 : index
      %c0_22 = arith.constant 0 : index
      %33 = vector.load %arg6[%c0_21, %c0_22] : memref<128x128xbf16, #tpu.memory_space<vmem>>, vector<128x128xbf16>
      %cst_23 = arith.constant dense<0.000000e+00> : vector<256x128xf32>
      %34 = tpu.matmul %32, %33, %cst_23 {dimension_numbers = #tpu.dot_dimension_numbers<[1], [0], [0], [1], [0, 0, 1, 1], [], []>} : vector<256x128xbf16>, vector<128x128xbf16>, vector<256x128xf32> -> vector<256x128xf32>
      %c0_24 = arith.constant 0 : index
      %c0_25 = arith.constant 0 : index
      %35 = vector.load %arg7[%c0_24, %c0_25] : memref<1x128xf32, #tpu.memory_space<vmem>>, vector<1x128xf32>
      %36 = vector.broadcast %35 : vector<1x128xf32> to vector<256x128xf32>
      %37 = arith.addf %34, %36 : vector<256x128xf32>
      %c0_26 = arith.constant 0 : index
      %c0_27 = arith.constant 0 : index
      %38 = vector.load %arg8[%c0_26, %c0_27] : memref<128x128xbf16, #tpu.memory_space<vmem>>, vector<128x128xbf16>
      %cst_28 = arith.constant dense<0.000000e+00> : vector<256x128xf32>
      %39 = tpu.matmul %32, %38, %cst_28 {dimension_numbers = #tpu.dot_dimension_numbers<[1], [0], [0], [1], [0, 0, 1, 1], [], []>} : vector<256x128xbf16>, vector<128x128xbf16>, vector<256x128xf32> -> vector<256x128xf32>
      %c0_29 = arith.constant 0 : index
      %c0_30 = arith.constant 0 : index
      %40 = vector.load %arg9[%c0_29, %c0_30] : memref<1x128xf32, #tpu.memory_space<vmem>>, vector<1x128xf32>
      %41 = vector.broadcast %40 : vector<1x128xf32> to vector<256x128xf32>
      %42 = arith.addf %39, %41 : vector<256x128xf32>
      %43 = tpu.transpose %37, [1, 0] : vector<256x128xf32> -> vector<128x256xf32>
      %44 = arith.truncf %43 : vector<128x256xf32> to vector<128x256xbf16>
      %c0_31 = arith.constant 0 : index
      %c0_32 = arith.constant 0 : index
      %45 = vector.load %arg11[%c0_31, %c0_32] : memref<128x256xbf16, #tpu.memory_space<vmem>>, vector<128x256xbf16>
      tpu.vector_store %arg11[%c0_31, %c0_32], %44 {strides = array<i32>} : memref<128x256xbf16, #tpu.memory_space<vmem>>, vector<128x256xbf16>,
      %46 = arith.truncf %42 : vector<256x128xf32> to vector<256x128xbf16>
      %c0_33 = arith.constant 0 : index
      %c0_34 = arith.constant 0 : index
      %47 = vector.load %arg12[%c0_33, %c0_34] : memref<256x128xbf16, #tpu.memory_space<vmem>>, vector<256x128xbf16>
      tpu.vector_store %arg12[%c0_33, %c0_34], %46 {strides = array<i32>} : memref<256x128xbf16, #tpu.memory_space<vmem>>, vector<256x128xbf16>,
    } else {
    }
    %c0 = arith.constant 0 : index
    %c0_1 = arith.constant 0 : index
    %c0_2 = arith.constant 0 : index
    %3 = vector.load %arg2[%c0, %c0_1, %c0_2] : memref<1x64x128xf32, #tpu.memory_space<vmem>>, vector<1x64x128xf32>
    %4 = vector.shape_cast %3 : vector<1x64x128xf32> to vector<64x128xf32>
    %5 = arith.truncf %4 : vector<64x128xf32> to vector<64x128xbf16>
    %c0_3 = arith.constant 0 : index
    %c0_4 = arith.constant 0 : index
    %6 = vector.load %arg4[%c0_3, %c0_4] : memref<128x128xbf16, #tpu.memory_space<vmem>>, vector<128x128xbf16>
    %cst = arith.constant dense<0.000000e+00> : vector<64x128xf32>
    %7 = tpu.matmul %5, %6, %cst {dimension_numbers = #tpu.dot_dimension_numbers<[1], [0], [0], [1], [0, 0, 1, 1], [], []>} : vector<64x128xbf16>, vector<128x128xbf16>, vector<64x128xf32> -> vector<64x128xf32>
    %c0_5 = arith.constant 0 : index
    %c0_6 = arith.constant 0 : index
    %8 = vector.load %arg5[%c0_5, %c0_6] : memref<1x128xf32, #tpu.memory_space<vmem>>, vector<1x128xf32>
    %9 = vector.broadcast %8 : vector<1x128xf32> to vector<64x128xf32>
    %10 = arith.addf %7, %9 : vector<64x128xf32>
    %11 = arith.truncf %10 : vector<64x128xf32> to vector<64x128xbf16>
    %c0_7 = arith.constant 0 : index
    %c0_8 = arith.constant 0 : index
    %12 = vector.load %arg11[%c0_7, %c0_8] : memref<128x256xbf16, #tpu.memory_space<vmem>>, vector<128x256xbf16>
    %cst_9 = arith.constant dense<0.000000e+00> : vector<64x256xf32>
    %13 = tpu.matmul %11, %12, %cst_9 {dimension_numbers = #tpu.dot_dimension_numbers<[1], [0], [0], [1], [0, 0, 1, 1], [], []>} : vector<64x128xbf16>, vector<128x256xbf16>, vector<64x256xf32> -> vector<64x256xf32>
    %cst_10 = arith.constant dense<0xFF800000> : vector<64xf32>
    %14 = vector.multi_reduction <maximumf>, %13, %cst_10 [1] : vector<64x256xf32> to vector<64xf32>
    %15 = vector.shape_cast %14 : vector<64xf32> to vector<64x1xf32>
    %16 = vector.broadcast %15 : vector<64x1xf32> to vector<64x256xf32>
    %17 = arith.subf %13, %16 : vector<64x256xf32>
    %18 = math.exp %17 : vector<64x256xf32>
    %cst_11 = arith.constant dense<0.000000e+00> : vector<64xf32>
    %19 = vector.multi_reduction <add>, %18, %cst_11 [1] : vector<64x256xf32> to vector<64xf32>
    %20 = vector.shape_cast %19 : vector<64xf32> to vector<64x1xf32>
    %21 = tpu.reciprocal %20 {approx = true} : vector<64x1xf32> -> vector<64x1xf32>
    %22 = arith.truncf %18 : vector<64x256xf32> to vector<64x256xbf16>
    %c0_12 = arith.constant 0 : index
    %c0_13 = arith.constant 0 : index
    %23 = vector.load %arg12[%c0_12, %c0_13] : memref<256x128xbf16, #tpu.memory_space<vmem>>, vector<256x128xbf16>
    %cst_14 = arith.constant dense<0.000000e+00> : vector<64x128xf32>
    %24 = tpu.matmul %22, %23, %cst_14 {dimension_numbers = #tpu.dot_dimension_numbers<[1], [0], [0], [1], [0, 0, 1, 1], [], []>} : vector<64x256xbf16>, vector<256x128xbf16>, vector<64x128xf32> -> vector<64x128xf32>
    %25 = vector.broadcast %21 : vector<64x1xf32> to vector<64x128xf32>
    %26 = arith.mulf %24, %25 : vector<64x128xf32>
    %27 = arith.addf %26, %4 : vector<64x128xf32>
    %c0_15 = arith.constant 0 : index
    %c0_16 = arith.constant 0 : index
    %c0_17 = arith.constant 0 : index
    %28 = vector.load %arg10[%c0_15, %c0_16, %c0_17] : memref<1x64x128xf32, #tpu.memory_space<vmem>>, vector<1x64x128xf32>
    %29 = vector.shape_cast %28 : vector<1x64x128xf32> to vector<64x128xf32>
    %30 = vector.shape_cast %27 : vector<64x128xf32> to vector<1x64x128xf32>
    tpu.vector_store %arg10[%c0_15, %c0_16, %c0_17], %30 {strides = array<i32>} : memref<1x64x128xf32, #tpu.memory_space<vmem>>, vector<1x64x128xf32>,
    return
  }
  func.func @transform_0(%arg0: i32, %arg1: i32) -> (i32, i32, i32) {
    %c0_i32 = arith.constant 0 : i32
    %c0_i32_0 = arith.constant 0 : i32
    return %arg0, %arg1, %c0_i32 : i32, i32, i32
  }
  func.func @transform_1(%arg0: i32, %arg1: i32) -> (i32, i32, i32) {
    %c0_i32 = arith.constant 0 : i32
    %c0_i32_0 = arith.constant 0 : i32
    %c0_i32_1 = arith.constant 0 : i32
    return %arg0, %c0_i32, %c0_i32_0 : i32, i32, i32
  }
  func.func @transform_2(%arg0: i32, %arg1: i32) -> (i32, i32) {
    %c0_i32 = arith.constant 0 : i32
    %c0_i32_0 = arith.constant 0 : i32
    %c0_i32_1 = arith.constant 0 : i32
    return %c0_i32, %c0_i32_0 : i32, i32
  }
  func.func @transform_3(%arg0: i32, %arg1: i32) -> (i32, i32) {
    %c0_i32 = arith.constant 0 : i32
    %c0_i32_0 = arith.constant 0 : i32
    %c0_i32_1 = arith.constant 0 : i32
    return %c0_i32, %c0_i32_0 : i32, i32
  }
  func.func @transform_4(%arg0: i32, %arg1: i32) -> (i32, i32) {
    %c0_i32 = arith.constant 0 : i32
    %c0_i32_0 = arith.constant 0 : i32
    %c0_i32_1 = arith.constant 0 : i32
    return %c0_i32, %c0_i32_0 : i32, i32
  }
  func.func @transform_5(%arg0: i32, %arg1: i32) -> (i32, i32) {
    %c0_i32 = arith.constant 0 : i32
    %c0_i32_0 = arith.constant 0 : i32
    %c0_i32_1 = arith.constant 0 : i32
    return %c0_i32, %c0_i32_0 : i32, i32
  }
  func.func @transform_6(%arg0: i32, %arg1: i32) -> (i32, i32) {
    %c0_i32 = arith.constant 0 : i32
    %c0_i32_0 = arith.constant 0 : i32
    %c0_i32_1 = arith.constant 0 : i32
    return %c0_i32, %c0_i32_0 : i32, i32
  }
  func.func @transform_7(%arg0: i32, %arg1: i32) -> (i32, i32) {
    %c0_i32 = arith.constant 0 : i32
    %c0_i32_0 = arith.constant 0 : i32
    %c0_i32_1 = arith.constant 0 : i32
    return %c0_i32, %c0_i32_0 : i32, i32
  }
  func.func @transform_8(%arg0: i32, %arg1: i32) -> (i32, i32, i32) {
    %c0_i32 = arith.constant 0 : i32
    %c0_i32_0 = arith.constant 0 : i32
    return %arg0, %arg1, %c0_i32 : i32, i32, i32
  }
}

</mosaic_0001>

<bundles_post_ra>
// kernel: tpu_custom_call.1
= control target key start
LH: loop header
LB: loop body
LE: loop exit
PB: predicated region body
PF: predicated region fallthrough
CT: control target
= control target key end

     0   :  { %s3460_s0 = inlined_call_operand.hbm [shape: f32[2,256,128], index: 0, kind: input, shape index: {}]   ;;  %s3461_s1 = inlined_call_operand.hbm [shape: bf16[2,256,128], index: 1, kind: input, shape index: {}]   ;;  %s3462_s2 = inlined_call_operand.hbm [shape: bf16[128,128], index: 2, kind: input, shape index: {}]   ;;  %s3463_s3 = inlined_call_operand.vmem [shape: f32[1,128], index: 3, kind: input, shape index: {}]   ;;  %s3464_s4 = inlined_call_operand.hbm [shape: bf16[128,128], index: 4, kind: input, shape index: {}]   ;;  %s3465_s5 = inlined_call_operand.vmem [shape: f32[1,128], index: 5, kind: input, shape index: {}]   ;;  %s3466_s6 = inlined_call_operand.hbm [shape: bf16[128,128], index: 6, kind: input, shape index: {}]   ;;  %s3467_s7 = inlined_call_operand.vmem [shape: f32[1,128], index: 7, kind: input, shape index: {}]   ;;  %s3468_s8 = inlined_call_operand.hbm [shape: f32[2,256,128], index: 8, kind: output, shape index: {}]  }
   0x1   :  { %3483 = sst [smem:[#allocation25_spill]] %s3462_s2 }
   0x2   :  { %3484 = sst [smem:[#allocation26_spill]] %s3463_s3 }
   0x3   :  { %3485 = sst [smem:[#allocation27_spill]] %s3464_s4 }
   0x4   :  { %3486 = sst [smem:[#allocation28_spill]] %s3465_s5 }
   0x5   :  { %3487 = sst [smem:[#allocation29_spill]] %s3466_s6 }
   0x6   :  { %3488 = sst [smem:[#allocation30_spill]] %s3467_s7 }
   0x7   :  { %3489 = sst [smem:[#allocation31_spill]] %s3468_s8 }
   0x8   :  { %13 = vsyncpa [#allocation5], 0 }
   0x9   :  { %15 = vsyncpa [#allocation5 + $0x1], 0 }
   0xa   :  { %16 = vsyncpa [#allocation8], 0 }
   0xb   :  { %18 = vsyncpa [#allocation8 + $0x1], 0 }
   0xc   :  { %19 = vsyncpa [#allocation11], 0 }
   0xd   :  { %20 = vsyncpa [#allocation6], 0 }
   0xe   :  { %22 = vsyncpa [#allocation6 + $0x1], 0  ;;  %s2758_s27 = smov 0   ;;  %s2760_s28 = smov 0  }
   0xf   :  { %s2762_s29 = smov 0   ;;  %s2764_s30 = smov 0  }
  0x10   :  { %s2766_s9 = smov 0   ;;  %s2768_s10 = smov 0  }
  0x11   :  { %s2770_s11 = smov 0   ;;  %s2772_s12 = smov 0  }
  0x12   :  { %s2774_s13 = smov 0   ;;  %s2776_s14 = smov 0  }
  0x13   :  { %s2778_s15 = smov 0  }
  0x14 LB: > { %3490 = sst [smem:[#allocation19_spill]] %s2670_s30  ;;  %s2812_s16 = sadd.s32 4294967295, %s2698_s15   ;;  %s2698_s15 = sphi %s2778_s15, %s28_s15   ;;  %s2694_s14 = sphi %s2776_s14, %s3544_s14   ;;  %s2690_s13 = sphi %s2774_s13, %s3543_s13   ;;  %s2686_s12 = sphi %s2772_s12, %s3542_s12   ;;  %s2682_s11 = sphi %s2770_s11, %s3541_s11   ;;  %s2678_s10 = sphi %s2768_s10, %s3540_s10   ;;  %s2674_s9 = sphi %s2766_s9, %s3539_s9   ;;  %s2670_s30 = sphi %s2764_s30, %s3538_s30   ;;  %s2666_s29 = sphi %s2762_s29, %s3537_s29   ;;  %s2662_s28 = sphi %s2760_s28, %s3536_s28   ;;  %s2658_s27 = sphi %s2758_s27, %s3535_s27  }
  0x15   : > { %3491 = sst [smem:[#allocation20_spill]] %s2682_s11  ;;  %s1768_s17 = sadd.s32 4294967294, %s2698_s15  }
  0x16   : > { %3492 = sst [smem:[#allocation21_spill]] %s2686_s12  ;;  %p62_p0 = scmp.ne.s32.totalorder %s2674_s9, %s2670_s30 }
  0x17   : > { %p3472_p1 = scmp.eq.s32.totalorder %s2812_s16, 0  ;;  %p88_p2 = scmp.ne.s32.totalorder %s2662_s28, %s2658_s27 }
  0x18   : > { %p246_p5 = scmp.eq.s32.totalorder %s1768_s17, 7  ;;  %p1769_p7 = scmp.ge.s32.totalorder %s2698_s15, 1 }
  0x19   : > { %p2822_p4 = por %p3472_p1, %p62_p0  ;;  %p2828_p6 = por %p88_p2, %p3472_p1 }
  0x1a   : > { %p2833_p8 = por %p246_p5, %p62_p0  ;;  %p253_p9 = scmp.lt.s32.totalorder %s2698_s15, 9 }
  0x1b   : > { %s3493_s18 = scalar_select %p2822_p4, 1, 0 }
  0x1c   : > { %s3494_s19 = scalar_select %p2828_p6, 1, 0 }
  0x1d   : > { %s3496_s20 = scalar_select %p2833_p8, 1, 0 }
  0x1e   : > { %3495 = sst [smem:[#allocation22_spill]] %s3494_s19  ;;  %p2838_p10 = pnand %p1769_p7, %p253_p9 }
  0x1f   : > { %3497 = sst [smem:[#allocation23_spill]] %s3496_s20  ;;  %s2700_s22 = smov [#allocation9]  }
  0x20   : > { %s3498_s21 = scalar_select %p2838_p10, 1, 0 }
  0x21   : > { %s265_s23 = sshll.u32 %s2700_s22, 4  ;;  %p2093_p11 = pneg %p2838_p10  ;;  %s2842_s23 = int_to_ptr.vmem [resolvable:$true] %s265_s23 }
  0x22   : > { %s2701_s25 = smov [#allocation10]   ;;  %s2702_s27 = smov [#allocation12]  }
  0x23   : > { %p2848_p12 = pnand %p2093_p11, %p3472_p1  ;;  %s281_s26 = sshll.u32 %s2701_s25, 4  ;;  %s2852_s26 = int_to_ptr.vmem [resolvable:$true] %s281_s26 }
  0x24   : > { %s2854_s17 = sshll.u32 %s2702_s27, 4  ;;  %s3500_s2 = sld [smem:[#allocation25_spill]]  ;;  %s298_s17 = int_to_ptr.vmem [resolvable:$true] %s2854_s17 }
  0x25   : > { %p2864_p0 = pneg %p2848_p12 }
  0x2a   : > { %s2420_s22 = scalar_lea.hbm %s3500_s2, 1024 }
  0x2b   : > { %p2421_p13 = scmp.ne.s32.totalorder %s3500_s2, %s2420_s22  ;;  %p2427_p7 = scmp.lt.u32.totalorder %s2420_s22, %s3500_s2 }
  0x2d   : > { %p2423_p2 = pnand %p2864_p0, %p2421_p13 }
  0x2f   : > { %p2424_p5 = pneg %p2423_p2 }
  0x31   : > { %p2429_p9 = pnand %p2427_p7, %p2424_p5 }
  0x33   : > { %2432 = shalt.err (!%p2429_p9)
}
  0x34   : > { %s2433_s8 = scalar_lea.vmem %s2842_s23, 1024  ;;  %p2441_p8 = scmp.lt.s32.totalorder %s2842_s23, %s2842_s23 }
  0x35   : > { %p2434_p11 = scmp.ne.s32.totalorder %s2842_s23, %s2433_s8  ;;  %p2442_p6 = scmp.lt.s32.totalorder %s2433_s8, %s2433_s8 }
  0x37   : > { %p2436_p1 = pnand %p2434_p11, %p2864_p0  ;;  %p2443_p13 = por %p2442_p6, %p2441_p8 }
  0x39   : > { %p2437_p3 = pneg %p2436_p1 }
  0x3b   : > { %p2444_p2 = pnand %p2443_p13, %p2437_p3 }
  0x3d   : > { %2447 = shalt.err (!%p2444_p2)
}
  0x3e   : > { %s3478_s30 = smov 64   ;;  %s3479_s12 = smov 4  }
  0x3f   : > { %2096 = dma.hbm_to_vmem [thread:$0]  (!%p2848_p12), %s3500_s2, 1024, %s2842_s23, [#allocation8], %s3478_s30, %s3478_s30, %s3479_s12  }
  0x40   : > { %s3502_s4 = sld [smem:[#allocation27_spill]] }
  0x46   : > { %s2448_s8 = scalar_lea.hbm %s3502_s4, 1024 }
  0x47   : > { %p2449_p1 = scmp.ne.s32.totalorder %s3502_s4, %s2448_s8  ;;  %p2455_p8 = scmp.lt.u32.totalorder %s2448_s8, %s3502_s4 }
  0x49   : > { %p2451_p3 = pnand %p2449_p1, %p2864_p0 }
  0x4b   : > { %p2452_p6 = pneg %p2451_p3 }
  0x4d   : > { %p2457_p5 = pnand %p2455_p8, %p2452_p6 }
  0x4f   : > { %2460 = shalt.err (!%p2457_p5)
}
  0x50   : > { %s2461_s23 = scalar_lea.vmem %s2852_s26, 1024  ;;  %p2469_p13 = scmp.lt.s32.totalorder %s2852_s26, %s2852_s26 }
  0x51   : > { %p2462_p7 = scmp.ne.s32.totalorder %s2852_s26, %s2461_s23  ;;  %p2470_p2 = scmp.lt.s32.totalorder %s2461_s23, %s2461_s23 }
  0x53   : > { %p2464_p9 = pnand %p2462_p7, %p2864_p0  ;;  %p2471_p1 = por %p2470_p2, %p2469_p13 }
  0x55   : > { %p2465_p11 = pneg %p2464_p9 }
  0x57   : > { %p2472_p3 = pnand %p2471_p1, %p2465_p11 }
  0x59   : > { %2475 = shalt.err (!%p2472_p3)
}
  0x5a   : > { %2099 = dma.hbm_to_vmem [thread:$0]  (!%p2848_p12), %s3502_s4, 1024, %s2852_s26, [#allocation11], %s3478_s30, %s3478_s30, %s3479_s12  }
  0x5b   : > { %s3503_s6 = sld [smem:[#allocation29_spill]] }
  0x61   : > { %s2476_s20 = scalar_lea.hbm %s3503_s6, 1024 }
  0x62   : > { %p2477_p6 = scmp.ne.s32.totalorder %s3503_s6, %s2476_s20  ;;  %p2483_p7 = scmp.lt.u32.totalorder %s2476_s20, %s3503_s6 }
  0x64   : > { %p2479_p8 = pnand %p2477_p6, %p2864_p0 }
  0x66   : > { %p2480_p5 = pneg %p2479_p8 }
  0x68   : > { %p2485_p9 = pnand %p2483_p7, %p2480_p5 }
  0x6a   : > { %2488 = shalt.err (!%p2485_p9)
}
  0x6b   : > { %s2489_s23 = scalar_lea.vmem %s298_s17, 1024  ;;  %p2497_p1 = scmp.lt.s32.totalorder %s298_s17, %s298_s17 }
  0x6c   : > { %p2490_p11 = scmp.ne.s32.totalorder %s298_s17, %s2489_s23  ;;  %p2498_p3 = scmp.lt.s32.totalorder %s2489_s23, %s2489_s23 }
  0x6e   : > { %p2492_p13 = pnand %p2490_p11, %p2864_p0  ;;  %p2499_p4 = por %p2498_p3, %p2497_p1 }
  0x70   : > { %p2493_p2 = pneg %p2492_p13 }
  0x72   : > { %p2500_p10 = pnand %p2499_p4, %p2493_p2 }
  0x74   : > { %2503 = shalt.err (!%p2500_p10)
}
  0x75   : > { %2102 = dma.hbm_to_vmem [thread:$0]  (!%p2848_p12), %s3503_s6, 1024, %s298_s17, [#allocation11], %s3478_s30, %s3478_s30, %s3479_s12  }
  0x76   : > { %s37_s3 = sadd.s32 1, %s2690_s13  ;;  %s40_s24 = sadd.s32 1, %s2694_s14 }
  0x77   : > { %p38_p4 = scmp.ge.s32.totalorder %s37_s3, 4  ;;  %s49_s7 = sadd.s32 1, %s2678_s10 }
  0x78   : > { %p56_p10 = scmp.ne.s32.totalorder %s2678_s10, %s2674_s9  ;;  %p3482_p0 = scmp.eq.s32.totalorder %s2698_s15, 0 }
  0x79   : > { %s3546_s3 = smov (%p38_p4, %s37_s3), 0  ;;  %s3548_s24 = smov (!%p38_p4, %s40_s24), %s2694_s14 }
  0x7a   : > { %s45_s11 = ssub.s32 %s2690_s13, %s3546_s3  ;;  %p42_p6 = scmp.ge.s32.totalorder %s3548_s24, 2 }
  0x7b   : > { %p3504_p8 = scmp.eq.s32.totalorder %s2812_s16, 7  ;;  %p2955_p12 = por %p3482_p0, %p56_p10 }
  0x7c   : > { %p3481_p7 = scmp.lt.s32.totalorder %s2698_s15, 8  ;;  %s3550_s24 = smov (%p42_p6, %s3548_s24), 0 }
  0x7d   : > { %p2949_p5 = por %p3504_p8, %p56_p10  ;;  %3507 = sst [smem:[#allocation24_spill]] %s3550_s24 }
  0x7e   : > { %s314_s20 = sand.u32 1, %s2678_s10   ;;  %s1775_s22 = sshll.u32 %s2690_s13, 3 }
  0x7f   : > { %s2966_s25 = ssub.s32 %s2694_s14, %s3550_s24  ;;  %s1774_s8 = sshll.u32 %s314_s20, 6 }
  0x80   : > { %s46_s27 = sor.u32 %s45_s11, %s2966_s25  ;;  %s1776_s23 = sshll.u32 %s2694_s14, 5 }
  0x81   : > { %p47_p11 = scmp.eq.s32.totalorder %s46_s27, 0  ;;  %s324_s5 = sadd.s32 %s1776_s23, %s1775_s22 }
  0x82   : > { %s318_s30 = scalar_lea.vmem [#allocation4], %s1774_s8  ;;  %s1777_s2 = sshll.u32 %s324_s5, 7 }
  0x83   : > { %s2972_s26 = scalar_select %p47_p11, %s2678_s10, %s49_s7  }
  0x84   : > { %s327_s12 = sshll.u32 %s318_s30, 4  ;;  %s2979_s24 = scalar_lea.hbm %s3460_s0, %s1777_s2  ;;  %s2974_s12 = int_to_ptr.vmem [resolvable:$true] %s327_s12 }
  0x85   : > { %p2985_p13 = pnand %p3481_p7, %p2955_p12  ;;  %s2989_s30 = scalar_lea.sflag [#allocation5], %s314_s20 }
  0x86   : > { %s2504_s11 = scalar_lea.hbm %s2979_s24, 1024  ;;  %s2509_s6 = scalar_lea.hbm %s3460_s0, 8192 }
  0x87   : > { %p2505_p2 = scmp.ne.s32.totalorder %s2979_s24, %s2504_s11  ;;  %p2506_p1 = pneg %p2985_p13 }
  0x88   : > { %p2510_p10 = scmp.lt.u32.totalorder %s2979_s24, %s3460_s0  ;;  %p2511_p6 = scmp.lt.u32.totalorder %s2509_s6, %s2504_s11 }
  0x89   : > { %p2507_p3 = pnand %p2506_p1, %p2505_p2  ;;  %p2513_p12 = scmp.lt.u32.totalorder %s2504_s11, %s2979_s24 }
  0x8a   : > { %p2512_p8 = por %p2511_p6, %p2510_p10 }
  0x8b   : > { %p2508_p4 = pneg %p2507_p3 }
  0x8c   : > { %p2514_p11 = por %p2513_p12, %p2512_p8 }
  0x8e   : > { %p2515_p7 = pnand %p2514_p11, %p2508_p4 }
  0x90   : > { %2518 = shalt.err (!%p2515_p7)
}
  0x91   : > { %s2519_s20 = scalar_lea.vmem %s2974_s12, 1024  ;;  %s2705_s27 = smov [#allocation4]  }
  0x92   : > { %p2520_p2 = scmp.ne.s32.totalorder %s2974_s12, %s2519_s20  ;;  %s2524_s8 = sshll.u32 %s2705_s27, 4  ;;  %s2525_s8 = int_to_ptr.vmem [resolvable:$false] %s2524_s8 }
  0x93   : > { %s2526_s23 = scalar_lea.vmem %s2525_s8, 2048  ;;  %p2527_p9 = scmp.lt.s32.totalorder %s2974_s12, %s2525_s8 }
  0x94   : > { %p2522_p3 = pnand %p2520_p2, %p2506_p1  ;;  %p2528_p10 = scmp.lt.s32.totalorder %s2526_s23, %s2519_s20 }
  0x96   : > { %p2523_p0 = pneg %p2522_p3  ;;  %p2529_p6 = por %p2528_p10, %p2527_p9 }
  0x98   : > { %p2530_p8 = pnand %p2529_p6, %p2523_p0 }
  0x9a   : > { %2533 = shalt.err (!%p2530_p8)
}
  0x9b   : > { %s2706_s5 = smov 128   ;;  %s2707_s11 = smov 8  }
  0x9c   : > { %2106 = dma.hbm_to_vmem [thread:$0]  (!%p2985_p13), %s2979_s24, 1024, %s2974_s12, %s2989_s30, %s2706_s5, %s2706_s5, %s2707_s11  }
  0x9d   : > { %s337_s2 = sand.u32 1, %s2698_s15   ;;  %s75_s4 = sadd.s32 1, %s2666_s29 }
  0x9e   : > { %p82_p0 = scmp.ne.s32.totalorder %s2666_s29, %s2662_s28  ;;  %p3509_p7 = scmp.eq.s32.totalorder %s2966_s25, 0 }
  0x9f   : > { %p3510_p9 = scmp.eq.s32.totalorder %s2698_s15, 0  ;;  %s339_s17 = sand.u32 1, %s2666_s29  }
  0xa0   : > { %s3024_s6 = scalar_select %p3509_p7, %s2666_s29, %s75_s4  }
  0xa1   : > { %p84_p1 = por %p82_p0, %p3510_p9  ;;  %s1838_s22 = sshll.u32 %s2694_s14, 11 }
  0xa2   : > { %s1778_s20 = sshll.u32 %s339_s17, 7  ;;  %s3033_s23 = scalar_lea.hbm %s3461_s1, %s1838_s22 }
  0xa3   : > { %p3511_p4 = scmp.lt.s32.totalorder %s2698_s15, 8  ;;  %s341_s24 = scalar_lea.vmem [#allocation7], %s1778_s20 }
  0xa4   : > { %s348_s25 = sshll.u32 %s341_s24, 4  ;;  %s3043_s7 = scalar_lea.sflag [#allocation8], %s337_s2  ;;  %s3041_s25 = int_to_ptr.vmem [resolvable:$true] %s348_s25 }
  0xa5   : > { %p3037_p13 = pnand %p3511_p4, %p84_p1  ;;  %s2534_s30 = scalar_lea.hbm %s3033_s23, 2048 }
  0xa6   : > { %p2535_p12 = scmp.ne.s32.totalorder %s3033_s23, %s2534_s30  ;;  %s2539_s4 = scalar_lea.hbm %s3461_s1, 4096 }
  0xa7   : > { %p2536_p11 = pneg %p3037_p13  ;;  %p2540_p10 = scmp.lt.u32.totalorder %s3033_s23, %s3461_s1 }
  0xa8   : > { %p2541_p6 = scmp.lt.u32.totalorder %s2539_s4, %s2534_s30  ;;  %p2543_p0 = scmp.lt.u32.totalorder %s2534_s30, %s3033_s23 }
  0xa9   : > { %p2537_p2 = pnand %p2536_p11, %p2535_p12 }
  0xaa   : > { %p2542_p8 = por %p2541_p6, %p2540_p10 }
  0xab   : > { %p2538_p3 = pneg %p2537_p2 }
  0xac   : > { %p2544_p7 = por %p2543_p0, %p2542_p8 }
  0xae   : > { %p2545_p9 = pnand %p2544_p7, %p2538_p3 }
  0xb0   : > { %2548 = shalt.err (!%p2545_p9)
}
  0xb1   : > { %s2549_s2 = scalar_lea.vmem %s3041_s25, 2048  ;;  %s2708_s20 = smov [#allocation7]  }
  0xb2   : > { %p2550_p1 = scmp.ne.s32.totalorder %s3041_s25, %s2549_s2  ;;  %s2554_s27 = sshll.u32 %s2708_s20, 4  ;;  %s2555_s27 = int_to_ptr.vmem [resolvable:$false] %s2554_s27 }
  0xb3   : > { %s2556_s8 = scalar_lea.vmem %s2555_s27, 4096  ;;  %p2557_p2 = scmp.lt.s32.totalorder %s3041_s25, %s2555_s27 }
  0xb4   : > { %p2552_p4 = pnand %p2550_p1, %p2536_p11  ;;  %p2558_p10 = scmp.lt.s32.totalorder %s2556_s8, %s2549_s2 }
  0xb6   : > { %p2553_p12 = pneg %p2552_p4  ;;  %p2559_p6 = por %p2558_p10, %p2557_p2 }
  0xb8   : > { %p2560_p8 = pnand %p2559_p6, %p2553_p12 }
  0xba   : > { %2563 = shalt.err (!%p2560_p8)
}
  0xbb   : > { %s3513_s24 = smov 4   ;;  %s3514_s30 = smov 64  }
  0xbc   : > { %2109 = dma.hbm_to_vmem [thread:$0]  (!%p3037_p13), %s3033_s23, 2048, %s3041_s25, %s3043_s7, %s3514_s30, %s3514_s30, %s3513_s24  }
  0xbd   : > { %p3515_p11 = scmp.ne.s32.totalorder %s3498_s21, 0 }
  0xbe   : > { %s3077_s5 = sand.u32 (!%p3515_p11), 1, %s2674_s9   ;;  %p3516_p3 = scmp.ne.s32.totalorder (!%p3515_p11), %s3493_s18, 0 }
  0xbf   : > { %360 = sbr.rel (%p3515_p11) target bundleno = 1589 (0x635), region = 52  ;;  %s1782_s11 = sshll.u32 (!%p3515_p11), %s3077_s5, 6 }
  0xc0   : > { %s363_s4 = scalar_lea.sflag (!%p3515_p11), [#allocation5], %s3077_s5  ;;  %s3081_s17 = scalar_lea.vmem (!%p3515_p11), [#allocation4], %s1782_s11 }
  0xc6   : > { %2637 = dma.done.wait (%p3516_p3), %s363_s4, 1024  }
  0xc7   : > { %2639 = vsyncadd (%p3516_p3), %s363_s4, 4294966272  ;;  %s3517_s23 = sld [smem:[#allocation22_spill]]  ;;  %s371_s21 = sand.u32 1, %s2812_s16  }
  0xc8   : > { %s373_s12 = sand.u32 1, %s2662_s28   ;;  %s372_s7 = scalar_lea.sflag [#allocation8], %s371_s21 }
  0xc9   : > { %s1783_s25 = sshll.u32 %s373_s12, 7 }
  0xca   : > { %s3089_s22 = scalar_lea.vmem [#allocation7], %s1783_s25 }
  0xcd   : > { %p3518_p13 = scmp.ne.s32.totalorder %s3517_s23, 0 }
  0xcf   : > { %2641 = dma.done.wait (%p3518_p13), %s372_s7, 2048  }
  0xd0   : > { %2643 = vsyncadd (%p3518_p13), %s372_s7, 4294965248  ;;  %p3519_p0 = scmp.eq.s32.totalorder %s2812_s16, 0 }
  0xd2   : > { %2645 = dma.done.wait (%p3519_p0), [#allocation8], 1024   ;;  %p3520_p7 = pmov %p3519_p0 }
  0xd3   : > { %p3521_p9 = pmov %p3519_p0 }
  0xd4   : > { %2647 = vsyncadd (%p3520_p7), [#allocation8], 4294966272 }
  0xd5   : > { %2649 = dma.done.wait (%p3521_p9), [#allocation11], 2048   ;;  %p3522_p1 = pmov %p3519_p0 }
  0xd6   : > { %s3103_s18 = scalar_lea.vmem [#allocation13], %s1782_s11  ;;  %s3523_s2 = sld [smem:[#allocation20_spill]] }
  0xd7   : > { %2651 = vsyncadd (%p3522_p1), [#allocation11], 4294965248 }
  0xdc   : > { %p1788_p4 = scmp.ne.s32.totalorder %s3523_s2, 0 }
  0xdd   : > { %v2332_v0 = vld [vmem:[#allocation10] sm:$0xff] (!%p1788_p4)   ;;  %v2333_v1 = vld [vmem:[#allocation10 + $0x8] sm:$0xff] (!%p1788_p4)   ;;  %v2334_v2 = vld [vmem:[#allocation10 + $0x10] sm:$0xff] (!%p1788_p4)   ;;  %s3524_s27 = sld [smem:[#allocation30_spill]] (!%p1788_p4)  ;;  %s3525_s30 = sld [smem:[#allocation28_spill]] (!%p1788_p4) }
  0xde   : > { %431 = sbr.rel (%p1788_p4) target bundleno = 697 (0x2b9), region = 76  ;;  %1939 = vmatprep.subr.bf16.mxu0 (!%p1788_p4), %v2332_v0  ;;  %v2335_v3 = vld [vmem:[#allocation10 + $0x18] sm:$0xff] (!%p1788_p4)   ;;  %v2340_v4 = vld [vmem:[%s3089_s22] sm:$0xff] (!%p1788_p4)   ;;  %v2337_v6 = vld [vmem:[#allocation10 + $0x28] sm:$0xff] (!%p1788_p4)  }
  0xdf   : > { %1940 = vmatpush3.bf16.msra.mxu0 (!%p1788_p4), %v2332_v0  ;;  %1955 = vmatprep.mubr.bf16.mxu0 (!%p1788_p4), %v2340_v4  ;;  %v2336_v5 = vld [vmem:[#allocation10 + $0x20] sm:$0xff] (!%p1788_p4)   ;;  %v2338_v7 = vld [vmem:[#allocation10 + $0x30] sm:$0xff] (!%p1788_p4)   ;;  %v2339_v8 = vld [vmem:[#allocation10 + $0x38] sm:$0xff] (!%p1788_p4)  }
  0xe0   : > { %1941 = vmatprep.subr.bf16.mxu0 (!%p1788_p4), %v2333_v1  ;;  %2003 = vmatprep.mubr.bf16.mxu1 (!%p1788_p4), %v2340_v4  ;;  %v2356_v9 = vld [vmem:[#allocation12] sm:$0xff] (!%p1788_p4)   ;;  %v2357_v10 = vld [vmem:[#allocation12 + $0x8] sm:$0xff] (!%p1788_p4)   ;;  %v2358_v11 = vld [vmem:[#allocation12 + $0x10] sm:$0xff] (!%p1788_p4)  }
  0xe1   : > { %1987 = vmatprep.subr.bf16.mxu1 (!%p1788_p4), %v2356_v9  ;;  %v2341_v12 = vld [vmem:[%s3089_s22 + $0x8] sm:$0xff] (!%p1788_p4)   ;;  %v2342_v13 = vld [vmem:[%s3089_s22 + $0x10] sm:$0xff] (!%p1788_p4)   ;;  %v2359_v14 = vld [vmem:[#allocation12 + $0x18] sm:$0xff] (!%p1788_p4)  }
  0xe2   : > { %1988 = vmatpush3.bf16.msra.mxu1 (!%p1788_p4), %v2356_v9  ;;  %v2360_v15 = vld [vmem:[#allocation12 + $0x20] sm:$0xff] (!%p1788_p4)   ;;  %v2343_v16 = vld [vmem:[%s3089_s22 + $0x18] sm:$0xff] (!%p1788_p4)   ;;  %v2361_v18 = vld [vmem:[#allocation12 + $0x28] sm:$0xff] (!%p1788_p4)  }
  0xe3   : > { %1942 = vmatpush3.bf16.msra.mxu0 (!%p1788_p4), %v2333_v1  ;;  %1989 = vmatprep.subr.bf16.mxu1 (!%p1788_p4), %v2357_v10  ;;  %v2344_v17 = vld [vmem:[%s3089_s22 + $0x20] sm:$0xff] (!%p1788_p4)   ;;  %v2362_v19 = vld [vmem:[#allocation12 + $0x30] sm:$0xff] (!%p1788_p4)   ;;  %v2345_v20 = vld [vmem:[%s3089_s22 + $0x28] sm:$0xff] (!%p1788_p4)  }
  0xe4   : > { %1943 = vmatprep.subr.bf16.mxu0 (!%p1788_p4), %v2334_v2  ;;  %v2346_v21 = vld [vmem:[%s3089_s22 + $0x30] sm:$0xff] (!%p1788_p4)   ;;  %v2363_v22 = vld [vmem:[#allocation12 + $0x38] sm:$0xff] (!%p1788_p4)   ;;  %v2348_v24 = vld [vmem:[%s3089_s22 + $0x40] sm:$0xff] (!%p1788_p4)  }
  0xe5   : > { %v2347_v23 = vld [vmem:[%s3089_s22 + $0x38] sm:$0xff]   ;;  %v2349_v25 = vld [vmem:[%s3089_s22 + $0x48] sm:$0xff]   ;;  %v2350_v26 = vld [vmem:[%s3089_s22 + $0x50] sm:$0xff]  }
  0xe6   : > { %1990 = vmatpush3.bf16.msra.mxu1 %v2357_v10  ;;  %v2351_v27 = vld [vmem:[%s3089_s22 + $0x58] sm:$0xff]   ;;  %v2352_v28 = vld [vmem:[%s3089_s22 + $0x60] sm:$0xff]   ;;  %v2353_v29 = vld [vmem:[%s3089_s22 + $0x68] sm:$0xff]  }
  0xe7   : > { %1944 = vmatpush3.bf16.msra.mxu0 %v2334_v2  ;;  %1991 = vmatprep.subr.bf16.mxu1 %v2358_v11  ;;  %v2354_v30 = vld [vmem:[%s3089_s22 + $0x70] sm:$0xff]   ;;  %v2355_v31 = vld [vmem:[%s3089_s22 + $0x78] sm:$0xff]   ;;  %v3133_v44 = vld [vmem:[%s3524_s27] ss:$0 sm:$0xff] }
  0xe8   : > { %1945 = vmatprep.subr.bf16.mxu0 %v2335_v3  ;;  %v3148_v55 = vld [vmem:[%s3525_s30] ss:$0 sm:$0xff] }
  0xea   : > { %1992 = vmatpush3.bf16.msra.mxu1 %v2358_v11 }
  0xeb   : > { %1946 = vmatpush3.bf16.msra.mxu0 %v2335_v3  ;;  %1993 = vmatprep.subr.bf16.mxu1 %v2359_v14 }
  0xec   : > { %1947 = vmatprep.subr.bf16.mxu0 %v2336_v5 }
  0xee   : > { %1994 = vmatpush3.bf16.msra.mxu1 %v2359_v14 }
  0xef   : > { %1948 = vmatpush3.bf16.msra.mxu0 %v2336_v5  ;;  %1995 = vmatprep.subr.bf16.mxu1 %v2360_v15 }
  0xf0   : > { %1949 = vmatprep.subr.bf16.mxu0 %v2337_v6 }
  0xf2   : > { %1996 = vmatpush3.bf16.msra.mxu1 %v2360_v15 }
  0xf3   : > { %1950 = vmatpush3.bf16.msra.mxu0 %v2337_v6  ;;  %1997 = vmatprep.subr.bf16.mxu1 %v2361_v18 }
  0xf4   : > { %1951 = vmatprep.subr.bf16.mxu0 %v2338_v7 }
  0xf6   : > { %1998 = vmatpush3.bf16.msra.mxu1 %v2361_v18 }
  0xf7   : > { %1952 = vmatpush3.bf16.msra.mxu0 %v2338_v7  ;;  %1999 = vmatprep.subr.bf16.mxu1 %v2362_v19 }
  0xf8   : > { %1953 = vmatprep.subr.bf16.mxu0 %v2339_v8 }
  0xfa   : > { %2000 = vmatpush3.bf16.msra.mxu1 %v2362_v19 }
  0xfb   : > { %1954 = vmatpush3.bf16.msra.mxu0 %v2339_v8  ;;  %2001 = vmatprep.subr.bf16.mxu1 %v2363_v22 }
  0xfe   : > { %1956 = vmatmul.mubr.bf16.vlgmr.msra.gmra.mrb[0].mxu0 %v2341_v12  ;;  %2002 = vmatpush3.bf16.msra.mxu1 %v2363_v22 }
  0xff   : > { %1959 = vmatprep.mubr.bf16.mxu0 %v2342_v13 }
 0x101   : > { %2004 = vmatmul.mubr.bf16.vlgmr.msra.gmra.mrb[0].mxu1 %v2341_v12 }
 0x102   : > { %2007 = vmatprep.mubr.bf16.mxu1 %v2342_v13 }
 0x106   : > { %1960 = vmatmul.mubr.bf16.gmra.mrb[4].mxu0 %v2343_v16 }
 0x107   : > { %1963 = vmatprep.mubr.bf16.mxu0 %v2344_v17 }
 0x109   : > { %2008 = vmatmul.mubr.bf16.gmra.mrb[4].mxu1 %v2343_v16 }
 0x10a   : > { %2011 = vmatprep.mubr.bf16.mxu1 %v2344_v17 }
 0x10e   : > { %1964 = vmatmul.mubr.bf16.gmra.mrb[8].mxu0 %v2345_v20 }
 0x10f   : > { %1967 = vmatprep.mubr.bf16.mxu0 %v2346_v21 }
 0x111   : > { %2012 = vmatmul.mubr.bf16.gmra.mrb[8].mxu1 %v2345_v20 }
 0x112   : > { %2015 = vmatprep.mubr.bf16.mxu1 %v2346_v21 }
 0x116   : > { %1968 = vmatmul.mubr.bf16.gmra.mrb[12].mxu0 %v2347_v23 }
 0x117   : > { %1971 = vmatprep.mubr.bf16.mxu0 %v2348_v24 }
 0x119   : > { %2016 = vmatmul.mubr.bf16.gmra.mrb[12].mxu1 %v2347_v23 }
 0x11a   : > { %2019 = vmatprep.mubr.bf16.mxu1 %v2348_v24 }
 0x11e   : > { %1972 = vmatmul.mubr.bf16.gmra.mrb[16].mxu0 %v2349_v25 }
 0x11f   : > { %1975 = vmatprep.mubr.bf16.mxu0 %v2350_v26 }
 0x121   : > { %2020 = vmatmul.mubr.bf16.gmra.mrb[16].mxu1 %v2349_v25 }
 0x122   : > { %2023 = vmatprep.mubr.bf16.mxu1 %v2350_v26 }
 0x126   : > { %1976 = vmatmul.mubr.bf16.gmra.mrb[20].mxu0 %v2351_v27 }
 0x127   : > { %1979 = vmatprep.mubr.bf16.mxu0 %v2352_v28 }
 0x129   : > { %2024 = vmatmul.mubr.bf16.gmra.mrb[20].mxu1 %v2351_v27 }
 0x12a   : > { %2027 = vmatprep.mubr.bf16.mxu1 %v2352_v28 }
 0x12e   : > { %1980 = vmatmul.mubr.bf16.gmra.mrb[24].mxu0 %v2353_v29 }
 0x12f   : > { %1983 = vmatprep.mubr.bf16.mxu0 %v2354_v30 }
 0x131   : > { %2028 = vmatmul.mubr.bf16.gmra.mrb[24].mxu1 %v2353_v29 }
 0x132   : > { %2031 = vmatprep.mubr.bf16.mxu1 %v2354_v30 }
 0x136   : > { %1984 = vmatmul.mubr.bf16.gmra.mrb[28].mxu0 %v2355_v31 }
 0x139   : > { %2032 = vmatmul.mubr.bf16.gmra.mrb[28].mxu1 %v2355_v31 }
 0x1d1   : > { %v1957_v32 = vpop.f32.mrb[0].mxu0 }
 0x1d2   : > { %v665_v33 = vpop.f32.mrb[1].mxu0  ;;  %v674_v57 = vadd.f32 %v1957_v32, %v3148_v55 }
 0x1d3   : > { %v1958_v34 = vpop.f32.mrb[2].mxu0  ;;  %v666_v60 = vadd.f32 %v3148_v55, %v665_v33 }
 0x1d4   : > { %v668_v35 = vpop.f32.mrb[3].mxu0  ;;  %v2005_v46 = vpop.f32.mrb[0].mxu1  ;;  %v677_v63 = vadd.f32 %v1958_v34, %v3148_v55 }
 0x1d5   : > { %v906_v48 = vadd.f32 %v2005_v46, %v3133_v44  ;;  %v897_v49 = vpop.f32.mrb[1].mxu1  ;;  %v669_v3 = vadd.f32 %v3148_v55, %v668_v35 }
 0x1d6   : > { %v2006_v51 = vpop.f32.mrb[2].mxu1  ;;  %v898_v8 = vadd.f32 %v3133_v44, %v897_v49 }
 0x1d7   : > { %v909_v53 = vadd.f32 %v2006_v51, %v3133_v44  ;;  %v900_v9 = vpop.f32.mrb[3].mxu1 }
 0x1d8   : > { %v901_v11 = vadd.f32 %v3133_v44, %v900_v9 }
 0x1d9   : > { %v1961_v36 = vpop.f32.mrb[4].mxu0  ;;  %v1121_v54 = vpack.c.bf16 %v909_v53, %v906_v48 }
 0x1da   : > { %v681_v37 = vpop.f32.mrb[5].mxu0  ;;  %v3161_v12 = vadd.f32 %v1961_v36, %v3148_v55  ;;  %v1120_v18 = vpack.c.bf16 %v901_v11, %v898_v8 }
 0x1db   : > { %v1962_v38 = vpop.f32.mrb[6].mxu0  ;;  %1137 = vst [vmem:[#allocation3 + $0x8] sm:$0xff] %v1121_v54  ;;  %v682_v15 = vadd.f32 %v3148_v55, %v681_v37 }
 0x1dc   : > { %v684_v39 = vpop.f32.mrb[7].mxu0  ;;  %v3169_v19 = vadd.f32 %v1962_v38, %v3148_v55  ;;  %1136 = vst [vmem:[#allocation3] sm:$0xff] %v1120_v18  ;;  %v2009_v26 = vpop.f32.mrb[4].mxu1 }
 0x1dd   : > { %v685_v23 = vadd.f32 %v3148_v55, %v684_v39  ;;  %v913_v28 = vpop.f32.mrb[5].mxu1  ;;  %v922_v31 = vadd.f32 %v2009_v26, %v3133_v44 }
 0x1de   : > { %v2010_v30 = vpop.f32.mrb[6].mxu1  ;;  %v914_v32 = vadd.f32 %v3133_v44, %v913_v28 }
 0x1df   : > { %v925_v33 = vadd.f32 %v2010_v30, %v3133_v44  ;;  %v916_v34 = vpop.f32.mrb[7].mxu1 }
 0x1e0   : > { %v917_v36 = vadd.f32 %v3133_v44, %v916_v34 }
 0x1e1   : > { %v3122_v40 = vpop.f32.mrb[8].mxu0  ;;  %v1123_v46 = vpack.c.bf16 %v925_v33, %v922_v31 }
 0x1e2   : > { %v3124_v41 = vpop.f32.mrb[9].mxu0  ;;  %v3186_v37 = vadd.f32 %v3122_v40, %v3148_v55  ;;  %v1122_v53 = vpack.c.bf16 %v917_v36, %v914_v32 }
 0x1e3   : > { %v3126_v42 = vpop.f32.mrb[10].mxu0  ;;  %v698_v48 = vadd.f32 %v3148_v55, %v3124_v41  ;;  %1139 = vst [vmem:[#allocation3 + $0x18] sm:$0xff] %v1123_v46 }
 0x1e4   : > { %v3128_v43 = vpop.f32.mrb[11].mxu0  ;;  %v3196_v54 = vadd.f32 %v3126_v42, %v3148_v55  ;;  %1138 = vst [vmem:[#allocation3 + $0x10] sm:$0xff] %v1122_v53 }
 0x1e5   : > { %v701_v41 = vadd.f32 %v3148_v55, %v3128_v43 }
 0x1e9   : > { %v3135_v45 = vpop.f32.mrb[12].mxu0 }
 0x1ea   : > { %v3137_v47 = vpop.f32.mrb[13].mxu0 }
 0x1eb   : > { %v3140_v50 = vpop.f32.mrb[14].mxu0  ;;  %v714_v9 = vadd.f32 %v3148_v55, %v3137_v47 }
 0x1ec   : > { %v3142_v52 = vpop.f32.mrb[15].mxu0 }
 0x1ed   : > { %v717_v47 = vadd.f32 %v3148_v55, %v3142_v52 }
 0x1f1   : > { %v1973_v56 = vpop.f32.mrb[16].mxu0 }
 0x1f2   : > { %v738_v58 = vadd.f32 %v1973_v56, %v3148_v55  ;;  %v729_v59 = vpop.f32.mrb[17].mxu0 }
 0x1f3   : > { %v730_v61 = vadd.f32 %v3148_v55, %v729_v59  ;;  %v1974_v62 = vpop.f32.mrb[18].mxu0 }
 0x1f4   : > { %v741_v0 = vadd.f32 %v1974_v62, %v3148_v55  ;;  %v732_v1 = vpop.f32.mrb[19].mxu0  ;;  %v2224_v2 = vpack.i.bf16 %v738_v58, %v674_v57 }
 0x1f5   : > { %v733_v4 = vadd.f32 %v3148_v55, %v732_v1  ;;  %v2220_v5 = vpack.i.bf16 %v730_v61, %v666_v60  ;;  %v2013_v60 = vpop.f32.mrb[8].mxu1 }
 0x1f6   : > { %v2226_v6 = vpack.i.bf16 %v741_v0, %v677_v63  ;;  %v929_v61 = vpop.f32.mrb[9].mxu1  ;;  %v938_v0 = vadd.f32 %v2013_v60, %v3133_v44 }
 0x1f7   : > { %2221 = vxpose.xlu0.b32.start [1/16] %v2220_v5, 128  ;;  %v2222_v7 = vpack.i.bf16 %v733_v4, %v669_v3  ;;  %v2014_v63 = vpop.f32.mrb[10].mxu1  ;;  %v930_v1 = vadd.f32 %v3133_v44, %v929_v61  ;;  %v3214_v5 = vadd.f32 %v3135_v45, %v3148_v55 }
 0x1f8   : > { %v932_v3 = vpop.f32.mrb[11].mxu1 }
 0x1f9   : > { %v1977_v10 = vpop.f32.mrb[20].mxu0  ;;  %v933_v4 = vadd.f32 %v3133_v44, %v932_v3 }
 0x1fa   : > { %v3164_v13 = vadd.f32 %v1977_v10, %v3148_v55  ;;  %v745_v14 = vpop.f32.mrb[21].mxu0 }
 0x1fb   : > { %v746_v16 = vadd.f32 %v3148_v55, %v745_v14  ;;  %v1978_v17 = vpop.f32.mrb[22].mxu0  ;;  %2223 = vxpose.xlu0.b32.cont [2/16] %v2222_v7, 128  ;;  %v1124_v14 = vpack.c.bf16 %v933_v4, %v930_v1 }
 0x1fc   : > { %v3172_v20 = vadd.f32 %v1978_v17, %v3148_v55  ;;  %v748_v21 = vpop.f32.mrb[23].mxu0  ;;  %v2232_v22 = vpack.i.bf16 %v3164_v13, %v3161_v12 }
 0x1fd   : > { %v749_v24 = vadd.f32 %v3148_v55, %v748_v21  ;;  %v2228_v25 = vpack.i.bf16 %v746_v16, %v682_v15  ;;  %v3224_v15 = vadd.f32 %v3140_v50, %v3148_v55  ;;  %1140 = vst [vmem:[#allocation3 + $0x20] sm:$0xff] %v1124_v14 }
 0x1fe   : > { %v2234_v27 = vpack.i.bf16 %v3172_v20, %v3169_v19 }
 0x1ff   : > { %2225 = vxpose.xlu0.b32.cont [3/16] %v2224_v2, 128  ;;  %v2230_v29 = vpack.i.bf16 %v749_v24, %v685_v23  ;;  %v941_v2 = vadd.f32 %v2014_v63, %v3133_v44  ;;  %v2017_v23 = vpop.f32.mrb[12].mxu1 }
 0x200   : > { %v945_v24 = vpop.f32.mrb[13].mxu1  ;;  %v954_v28 = vadd.f32 %v2017_v23, %v3133_v44 }
 0x201   : > { %v1981_v35 = vpop.f32.mrb[24].mxu0  ;;  %v1125_v8 = vpack.c.bf16 %v941_v2, %v938_v0  ;;  %v2018_v26 = vpop.f32.mrb[14].mxu1 }
 0x202   : > { %v3189_v38 = vadd.f32 %v1981_v35, %v3148_v55  ;;  %v761_v39 = vpop.f32.mrb[25].mxu0  ;;  %v957_v52 = vadd.f32 %v2018_v26, %v3133_v44 }
 0x203   : > { %v762_v49 = vadd.f32 %v3148_v55, %v761_v39  ;;  %v1982_v51 = vpop.f32.mrb[26].mxu0  ;;  %2227 = vxpose.xlu0.b32.cont [4/16] %v2226_v6, 128  ;;  %1141 = vst [vmem:[#allocation3 + $0x28] sm:$0xff] %v1125_v8 }
 0x204   : > { %v3199_v40 = vadd.f32 %v1982_v51, %v3148_v55  ;;  %v764_v56 = vpop.f32.mrb[27].mxu0  ;;  %v2240_v57 = vpack.i.bf16 %v3189_v38, %v3186_v37  ;;  %v1127_v31 = vpack.c.bf16 %v957_v52, %v954_v28 }
 0x205   : > { %v765_v58 = vadd.f32 %v3148_v55, %v764_v56  ;;  %v2236_v59 = vpack.i.bf16 %v762_v49, %v698_v48 }
 0x206   : > { %v2242_v42 = vpack.i.bf16 %v3199_v40, %v3196_v54  ;;  %1143 = vst [vmem:[#allocation3 + $0x38] sm:$0xff] %v1127_v31 }
 0x207   : > { %2229 = vxpose.xlu0.b32.cont [5/16] %v2228_v25, 128  ;;  %v2238_v62 = vpack.i.bf16 %v765_v58, %v701_v41 }
 0x209   : > { %v1985_v43 = vpop.f32.mrb[28].mxu0 }
 0x20a   : > { %v3217_v6 = vadd.f32 %v1985_v43, %v3148_v55  ;;  %v777_v7 = vpop.f32.mrb[29].mxu0 }
 0x20b   : > { %v778_v10 = vadd.f32 %v3148_v55, %v777_v7  ;;  %v1986_v11 = vpop.f32.mrb[30].mxu0  ;;  %2231 = vxpose.xlu0.b32.cont [6/16] %v2230_v29, 128  ;;  %v946_v29 = vadd.f32 %v3133_v44, %v945_v24 }
 0x20c   : > { %v3227_v45 = vadd.f32 %v1986_v11, %v3148_v55  ;;  %v780_v16 = vpop.f32.mrb[31].mxu0  ;;  %v2248_v17 = vpack.i.bf16 %v3217_v6, %v3214_v5 }
 0x20d   : > { %v781_v18 = vadd.f32 %v3148_v55, %v780_v16  ;;  %v2244_v21 = vpack.i.bf16 %v778_v10, %v714_v9  ;;  %v948_v55 = vpop.f32.mrb[15].mxu1 }
 0x20e   : > { %v2250_v50 = vpack.i.bf16 %v3227_v45, %v3224_v15  ;;  %v949_v30 = vadd.f32 %v3133_v44, %v948_v55  ;;  %v2021_v12 = vpop.f32.mrb[16].mxu1 }
 0x20f   : > { %2233 = vxpose.xlu0.b32.cont [7/16] %v2232_v22, 128  ;;  %v2246_v25 = vpack.i.bf16 %v781_v18, %v717_v47  ;;  %v961_v13 = vpop.f32.mrb[17].mxu1  ;;  %v970_v33 = vadd.f32 %v2021_v12, %v3133_v44 }
 0x210   : > { %v1126_v32 = vpack.c.bf16 %v949_v30, %v946_v29  ;;  %v2022_v22 = vpop.f32.mrb[18].mxu1  ;;  %v962_v34 = vadd.f32 %v3133_v44, %v961_v13 }
 0x211   : > { %v973_v35 = vadd.f32 %v2022_v22, %v3133_v44  ;;  %v964_v36 = vpop.f32.mrb[19].mxu1 }
 0x212   : > { %1142 = vst [vmem:[#allocation3 + $0x30] sm:$0xff] %v1126_v32  ;;  %v965_v39 = vadd.f32 %v3133_v44, %v964_v36  ;;  %v2025_v20 = vpop.f32.mrb[20].mxu1 }
 0x213   : > { %2235 = vxpose.xlu0.b32.cont [8/16] %v2234_v27, 128  ;;  %v1129_v46 = vpack.c.bf16 %v973_v35, %v970_v33  ;;  %v977_v27 = vpop.f32.mrb[21].mxu1  ;;  %v986_v49 = vadd.f32 %v2025_v20, %v3133_v44 }
 0x214   : > { %v1128_v19 = vpack.c.bf16 %v965_v39, %v962_v34  ;;  %v2026_v48 = vpop.f32.mrb[22].mxu1  ;;  %v978_v51 = vadd.f32 %v3133_v44, %v977_v27 }
 0x215   : > { %1145 = vst [vmem:[#allocation3 + $0x48] sm:$0xff] %v1129_v46  ;;  %v989_v53 = vadd.f32 %v2026_v48, %v3133_v44  ;;  %v980_v56 = vpop.f32.mrb[23].mxu1 }
 0x216   : > { %1144 = vst [vmem:[#allocation3 + $0x40] sm:$0xff] %v1128_v19  ;;  %v981_v41 = vadd.f32 %v3133_v44, %v980_v56  ;;  %v2029_v37 = vpop.f32.mrb[24].mxu1 }
 0x217   : > { %2237 = vxpose.xlu0.b32.cont [9/16] %v2236_v59, 128  ;;  %v1131_v58 = vpack.c.bf16 %v989_v53, %v986_v49  ;;  %v993_v38 = vpop.f32.mrb[25].mxu1  ;;  %v1002_v60 = vadd.f32 %v2029_v37, %v3133_v44 }
 0x218   : > { %v1130_v59 = vpack.c.bf16 %v981_v41, %v978_v51  ;;  %v994_v61 = vadd.f32 %v3133_v44, %v993_v38 }
 0x219   : > { %1147 = vst [vmem:[#allocation3 + $0x58] sm:$0xff] %v1131_v58 }
 0x21a   : > { %1146 = vst [vmem:[#allocation3 + $0x50] sm:$0xff] %v1130_v59 }
 0x21b   : > { %2239 = vxpose.xlu0.b32.cont [10/16] %v2238_v62, 128 }
 0x21f   : > { %2241 = vxpose.xlu0.b32.cont [11/16] %v2240_v57, 128  ;;  %v2030_v57 = vpop.f32.mrb[26].mxu1 }
 0x220   : > { %v1005_v62 = vadd.f32 %v2030_v57, %v3133_v44  ;;  %v996_v63 = vpop.f32.mrb[27].mxu1 }
 0x221   : > { %v997_v0 = vadd.f32 %v3133_v44, %v996_v63  ;;  %v2033_v40 = vpop.f32.mrb[28].mxu1 }
 0x222   : > { %v1133_v1 = vpack.c.bf16 %v1005_v62, %v1002_v60  ;;  %v1018_v3 = vadd.f32 %v2033_v40, %v3133_v44 }
 0x223   : > { %2243 = vxpose.xlu0.b32.cont [12/16] %v2242_v42, 128  ;;  %v1132_v54 = vpack.c.bf16 %v997_v0, %v994_v61  ;;  %v1009_v42 = vpop.f32.mrb[29].mxu1 }
 0x224   : > { %1149 = vst [vmem:[#allocation3 + $0x68] sm:$0xff] %v1133_v1  ;;  %v2034_v2 = vpop.f32.mrb[30].mxu1  ;;  %v1010_v43 = vadd.f32 %v3133_v44, %v1009_v42 }
 0x225   : > { %1148 = vst [vmem:[#allocation3 + $0x60] sm:$0xff] %v1132_v54  ;;  %v1021_v4 = vadd.f32 %v2034_v2, %v3133_v44  ;;  %v1012_v7 = vpop.f32.mrb[31].mxu1 }
 0x226   : > { %v1013_v8 = vadd.f32 %v3133_v44, %v1012_v7 }
 0x227   : > { %2245 = vxpose.xlu0.b32.cont [13/16] %v2244_v21, 128  ;;  %v1135_v9 = vpack.c.bf16 %v1021_v4, %v1018_v3 }
 0x228   : > { %v1134_v10 = vpack.c.bf16 %v1013_v8, %v1010_v43 }
 0x229   : > { %1151 = vst [vmem:[#allocation3 + $0x78] sm:$0xff] %v1135_v9 }
 0x22a   : > { %1150 = vst [vmem:[#allocation3 + $0x70] sm:$0xff] %v1134_v10 }
 0x22b   : > { %2247 = vxpose.xlu0.b32.cont [14/16] %v2246_v25, 128 }
 0x22f   : > { %2249 = vxpose.xlu0.b32.cont [15/16] %v2248_v17, 128 }
 0x233   : > { %2251 = vxpose.xlu0.b32.end [16/16] %v2250_v50, 128 }
 0x277   : > { %v2252_v5 = vpop.trf.xlu0 }
 0x278   : > { %v2256_v6 = vunpack.i.h.bf16 %v2252_v5  ;;  %v2253_v11 = vunpack.i.l.bf16 %v2252_v5 }
 0x27b   : > { %v2257_v14 = vpop.trf.xlu0 }
 0x27c   : > { %v2261_v16 = vunpack.i.h.bf16 %v2257_v14  ;;  %v2258_v17 = vunpack.i.l.bf16 %v2257_v14 }
 0x27e   : > { %v1088_v47 = vpack.c.bf16 %v2258_v17, %v2253_v11  ;;  %v1089_v18 = vpack.c.bf16 %v2261_v16, %v2256_v6 }
 0x27f   : > { %v2262_v21 = vpop.trf.xlu0 }
 0x280   : > { %1104 = vst [vmem:[#allocation2] sm:$0xff] %v1088_v47  ;;  %1105 = vst [vmem:[#allocation2 + $0x8] sm:$0xff] %v1089_v18  ;;  %v2266_v44 = vunpack.i.h.bf16 %v2262_v21  ;;  %v2263_v23 = vunpack.i.l.bf16 %v2262_v21 }
 0x283   : > { %v2267_v24 = vpop.trf.xlu0 }
 0x284   : > { %v2271_v25 = vunpack.i.h.bf16 %v2267_v24  ;;  %v2268_v15 = vunpack.i.l.bf16 %v2267_v24 }
 0x286   : > { %v1090_v45 = vpack.c.bf16 %v2268_v15, %v2263_v23  ;;  %v1091_v50 = vpack.c.bf16 %v2271_v25, %v2266_v44 }
 0x287   : > { %v2272_v26 = vpop.trf.xlu0 }
 0x288   : > { %1106 = vst [vmem:[#allocation2 + $0x10] sm:$0xff] %v1090_v45  ;;  %1107 = vst [vmem:[#allocation2 + $0x18] sm:$0xff] %v1091_v50  ;;  %v2276_v28 = vunpack.i.h.bf16 %v2272_v26  ;;  %v2273_v29 = vunpack.i.l.bf16 %v2272_v26 }
 0x28b   : > { %v2277_v52 = vpop.trf.xlu0 }
 0x28c   : > { %v2281_v55 = vunpack.i.h.bf16 %v2277_v52  ;;  %v2278_v30 = vunpack.i.l.bf16 %v2277_v52 }
 0x28e   : > { %v1092_v31 = vpack.c.bf16 %v2278_v30, %v2273_v29  ;;  %v1093_v32 = vpack.c.bf16 %v2281_v55, %v2276_v28 }
 0x28f   : > { %v2282_v12 = vpop.trf.xlu0 }
 0x290   : > { %1108 = vst [vmem:[#allocation2 + $0x20] sm:$0xff] %v1092_v31  ;;  %1109 = vst [vmem:[#allocation2 + $0x28] sm:$0xff] %v1093_v32  ;;  %v2286_v13 = vunpack.i.h.bf16 %v2282_v12  ;;  %v2283_v22 = vunpack.i.l.bf16 %v2282_v12 }
 0x293   : > { %v2287_v33 = vpop.trf.xlu0 }
 0x294   : > { %v2291_v34 = vunpack.i.h.bf16 %v2287_v33  ;;  %v2288_v35 = vunpack.i.l.bf16 %v2287_v33 }
 0x296   : > { %v1094_v36 = vpack.c.bf16 %v2288_v35, %v2283_v22  ;;  %v1095_v39 = vpack.c.bf16 %v2291_v34, %v2286_v13 }
 0x297   : > { %v2292_v46 = vpop.trf.xlu0 }
 0x298   : > { %1110 = vst [vmem:[#allocation2 + $0x30] sm:$0xff] %v1094_v36  ;;  %1111 = vst [vmem:[#allocation2 + $0x38] sm:$0xff] %v1095_v39  ;;  %v2296_v19 = vunpack.i.h.bf16 %v2292_v46  ;;  %v2293_v20 = vunpack.i.l.bf16 %v2292_v46 }
 0x29b   : > { %v2297_v27 = vpop.trf.xlu0 }
 0x29c   : > { %v2301_v48 = vunpack.i.h.bf16 %v2297_v27  ;;  %v2298_v49 = vunpack.i.l.bf16 %v2297_v27 }
 0x29e   : > { %v1096_v51 = vpack.c.bf16 %v2298_v49, %v2293_v20  ;;  %v1097_v53 = vpack.c.bf16 %v2301_v48, %v2296_v19 }
 0x29f   : > { %v2302_v56 = vpop.trf.xlu0 }
 0x2a0   : > { %1112 = vst [vmem:[#allocation2 + $0x40] sm:$0xff] %v1096_v51  ;;  %1113 = vst [vmem:[#allocation2 + $0x48] sm:$0xff] %v1097_v53  ;;  %v2306_v41 = vunpack.i.h.bf16 %v2302_v56  ;;  %v2303_v58 = vunpack.i.l.bf16 %v2302_v56 }
 0x2a3   : > { %v2307_v59 = vpop.trf.xlu0 }
 0x2a4   : > { %v2311_v37 = vunpack.i.h.bf16 %v2307_v59  ;;  %v2308_v38 = vunpack.i.l.bf16 %v2307_v59 }
 0x2a6   : > { %v1098_v57 = vpack.c.bf16 %v2308_v38, %v2303_v58  ;;  %v1099_v60 = vpack.c.bf16 %v2311_v37, %v2306_v41 }
 0x2a7   : > { %v2312_v61 = vpop.trf.xlu0 }
 0x2a8   : > { %1114 = vst [vmem:[#allocation2 + $0x50] sm:$0xff] %v1098_v57  ;;  %1115 = vst [vmem:[#allocation2 + $0x58] sm:$0xff] %v1099_v60  ;;  %v2316_v62 = vunpack.i.h.bf16 %v2312_v61  ;;  %v2313_v63 = vunpack.i.l.bf16 %v2312_v61 }
 0x2ab   : > { %v2317_v0 = vpop.trf.xlu0 }
 0x2ac   : > { %v2321_v1 = vunpack.i.h.bf16 %v2317_v0  ;;  %v2318_v54 = vunpack.i.l.bf16 %v2317_v0 }
 0x2ae   : > { %v1100_v40 = vpack.c.bf16 %v2318_v54, %v2313_v63  ;;  %v1101_v42 = vpack.c.bf16 %v2321_v1, %v2316_v62 }
 0x2af   : > { %v2322_v2 = vpop.trf.xlu0 }
 0x2b0   : > { %1116 = vst [vmem:[#allocation2 + $0x60] sm:$0xff] %v1100_v40  ;;  %1117 = vst [vmem:[#allocation2 + $0x68] sm:$0xff] %v1101_v42  ;;  %v2326_v3 = vunpack.i.h.bf16 %v2322_v2  ;;  %v2323_v43 = vunpack.i.l.bf16 %v2322_v2 }
 0x2b3   : > { %v2327_v4 = vpop.trf.xlu0 }
 0x2b4   : > { %v2331_v7 = vunpack.i.h.bf16 %v2327_v4  ;;  %v2328_v8 = vunpack.i.l.bf16 %v2327_v4 }
 0x2b6   : > { %v1102_v9 = vpack.c.bf16 %v2328_v8, %v2323_v43  ;;  %v1103_v10 = vpack.c.bf16 %v2331_v7, %v2326_v3 }
 0x2b8   : > { %1118 = vst [vmem:[#allocation2 + $0x70] sm:$0xff] %v1102_v9  ;;  %1119 = vst [vmem:[#allocation2 + $0x78] sm:$0xff] %v1103_v10 }
 0x2b9 PF: > { %v2364_v5 = vld [vmem:[#allocation9] sm:$0xff]   ;;  %v2365_v6 = vld [vmem:[#allocation9 + $0x8] sm:$0xff]   ;;  %v2366_v11 = vld [vmem:[#allocation9 + $0x10] sm:$0xff]   ;;  %v2709_v48 = vmov 0   ;;  %s3526_s23 = sld [smem:[#allocation26_spill]]  ;;  %s3528_s21 = sld [smem:[#allocation21_spill]] }
 0x2ba   : > { %2035 = vmatprep.subr.bf16.mxu0 %v2364_v5  ;;  %v2367_v14 = vld [vmem:[#allocation9 + $0x18] sm:$0xff]   ;;  %v3275_v16 = vld [vmem:[%s3081_s17] sm:$0xff]  ;;  %v3278_v17 = vld [vmem:[%s3081_s17 + $0x8] sm:$0xff]  ;;  %1352 = vmatprep.mubr.bf16.mxu1 %v2709_v48  ;;  %s1626_s2 = sshll.u32 %s3103_s18, 4  ;;  %s3529_s27 = sld [smem:[#allocation31_spill]]  ;;  %s3394_s2 = int_to_ptr.vmem [resolvable:$true] %s1626_s2 }
 0x2bb   : > { %2036 = vmatpush3.bf16.msra.mxu0 %v2364_v5  ;;  %v1160_v47 = vpack.c.bf16 %v3278_v17, %v3275_v16  ;;  %v1305_v18 = vld [vmem:[#allocation2 + $0x8] sm:$0xff]  ;;  %v1304_v21 = vld [vmem:[#allocation2] sm:$0xff]  ;;  %v1307_v44 = vld [vmem:[#allocation2 + $0x18] sm:$0xff]  ;;  %s1611_s30 = scalar_lea.sflag [#allocation6], %s3077_s5  ;;  %s2564_s11 = scalar_lea.vmem %s3394_s2, 1024 }
 0x2bc   : > { %2037 = vmatprep.subr.bf16.mxu0 %v2365_v6  ;;  %v2368_v23 = vld [vmem:[#allocation9 + $0x20] sm:$0xff]   ;;  %1320 = vmatprep.subr.bf16.mxu1 %v1305_v18  ;;  %v1306_v24 = vld [vmem:[#allocation2 + $0x10] sm:$0xff]  ;;  %v1309_v25 = vld [vmem:[#allocation2 + $0x28] sm:$0xff]  ;;  %p2565_p12 = scmp.ne.s32.totalorder %s3394_s2, %s2564_s11  ;;  %s2710_s4 = smov [#allocation13]  }
 0x2bd   : > { %2051 = vmatprep.mubr.bf16.mxu0 %v1160_v47  ;;  %1321 = vmatpush1.bf16.msra.mxu1 %v1304_v21  ;;  %v2369_v15 = vld [vmem:[#allocation9 + $0x28] sm:$0xff]   ;;  %v1308_v45 = vld [vmem:[#allocation2 + $0x20] sm:$0xff]  ;;  %v1311_v50 = vld [vmem:[#allocation2 + $0x38] sm:$0xff] }
 0x2be   : > { %1322 = vmatprep.subr.bf16.mxu1 %v1307_v44  ;;  %v2370_v26 = vld [vmem:[#allocation9 + $0x30] sm:$0xff]   ;;  %v1313_v29 = vld [vmem:[#allocation2 + $0x48] sm:$0xff]  ;;  %v2371_v52 = vld [vmem:[#allocation9 + $0x38] sm:$0xff]   ;;  %p2566_p2 = pnand %p2565_p12, %p2949_p5 }
 0x2bf   : > { %2038 = vmatpush3.bf16.msra.mxu0 %v2365_v6  ;;  %v1310_v28 = vld [vmem:[#allocation2 + $0x30] sm:$0xff]  ;;  %v1312_v55 = vld [vmem:[#allocation2 + $0x40] sm:$0xff]  ;;  %v3286_v31 = vld [vmem:[%s3081_s17 + $0x18] sm:$0xff]  ;;  %s1834_s25 = sshll.u32 %s3528_s21, 5 }
 0x2c0   : > { %2039 = vmatprep.subr.bf16.mxu0 %v2366_v11  ;;  %v3283_v30 = vld [vmem:[%s3081_s17 + $0x10] sm:$0xff]  ;;  %v1315_v32 = vld [vmem:[#allocation2 + $0x58] sm:$0xff]  ;;  %v3289_v12 = vld [vmem:[%s3081_s17 + $0x20] sm:$0xff]  ;;  %s3530_s8 = smov %s3529_s27  ;;  %p2567_p10 = pneg %p2566_p2 }
 0x2c1   : > { %1323 = vmatpush1.bf16.msra.mxu1 %v1306_v24  ;;  %v3292_v13 = vld [vmem:[%s3081_s17 + $0x28] sm:$0xff]  ;;  %v1161_v22 = vpack.c.bf16 %v3286_v31, %v3283_v30  ;;  %v1314_v33 = vld [vmem:[#allocation2 + $0x50] sm:$0xff]  ;;  %v3302_v36 = vld [vmem:[%s3081_s17 + $0x38] sm:$0xff] }
 0x2c2   : > { %1324 = vmatprep.subr.bf16.mxu1 %v1309_v25  ;;  %v1162_v34 = vpack.c.bf16 %v3292_v13, %v3289_v12  ;;  %v3299_v35 = vld [vmem:[%s3081_s17 + $0x30] sm:$0xff]  ;;  %v1317_v46 = vld [vmem:[#allocation2 + $0x68] sm:$0xff]  ;;  %v1316_v19 = vld [vmem:[#allocation2 + $0x60] sm:$0xff]  ;;  %s3527_s17 = sld [smem:[#allocation20_spill]] }
 0x2c3   : > { %2040 = vmatpush3.bf16.msra.mxu0 %v2366_v11  ;;  %v1163_v39 = vpack.c.bf16 %v3302_v36, %v3299_v35  ;;  %v1319_v20 = vld [vmem:[#allocation2 + $0x78] sm:$0xff]  ;;  %v1318_v27 = vld [vmem:[#allocation2 + $0x70] sm:$0xff]  ;;  %v1823_v51 = vld [vmem:[%s3526_s23] ss:$0 sm:$0xff]  ;;  %s2568_s23 = sshll.u32 %s2710_s4, 4  ;;  %s2569_s23 = int_to_ptr.vmem [resolvable:$false] %s2568_s23 }
 0x2c4   : > { %2041 = vmatprep.subr.bf16.mxu0 %v2367_v14  ;;  %v1513_v43 = vld [vmem:[#allocation3 + $0x40] sm:$0xff]  ;;  %v1514_v7 = vld [vmem:[#allocation3 + $0x48] sm:$0xff]  ;;  %v1515_v9 = vld [vmem:[#allocation3 + $0x50] sm:$0xff]  ;;  %p2571_p6 = scmp.lt.s32.totalorder %s3394_s2, %s2569_s23 }
 0x2c5   : > { %1325 = vmatpush1.bf16.msra.mxu1 %v1308_v45  ;;  %v1505_v4 = vld [vmem:[#allocation3] sm:$0xff]  ;;  %v1506_v8 = vld [vmem:[#allocation3 + $0x8] sm:$0xff]  ;;  %v1507_v10 = vld [vmem:[#allocation3 + $0x10] sm:$0xff] }
 0x2c6   : > { %1326 = vmatprep.subr.bf16.mxu1 %v1311_v50 }
 0x2c7   : > { %2042 = vmatpush3.bf16.msra.mxu0 %v2367_v14 }
 0x2c8   : > { %2043 = vmatprep.subr.bf16.mxu0 %v2368_v23  ;;  %s1833_s12 = sshll.u32 %s3527_s17, 3  ;;  %s2570_s17 = scalar_lea.vmem %s2569_s23, 2048 }
 0x2c9   : > { %1327 = vmatpush1.bf16.msra.mxu1 %v1310_v28  ;;  %s1623_s7 = sadd.s32 %s1834_s25, %s1833_s12  ;;  %p2572_p8 = scmp.lt.s32.totalorder %s2570_s17, %s2564_s11 }
 0x2ca   : > { %1328 = vmatprep.subr.bf16.mxu1 %v1313_v29  ;;  %s1835_s22 = sshll.u32 %s1623_s7, 7 }
 0x2cb   : > { %2044 = vmatpush3.bf16.msra.mxu0 %v2368_v23  ;;  %s3392_s24 = scalar_lea.hbm %s3529_s27, %s1835_s22  ;;  %p2573_p11 = por %p2572_p8, %p2571_p6 }
 0x2cc   : > { %2045 = vmatprep.subr.bf16.mxu0 %v2369_v15 }
 0x2cd   : > { %1329 = vmatpush1.bf16.msra.mxu1 %v1312_v55  ;;  %v1516_v55 = vld [vmem:[#allocation3 + $0x58] sm:$0xff]  ;;  %p2574_p3 = pnand %p2573_p11, %p2567_p10 }
 0x2ce   : > { %1330 = vmatprep.subr.bf16.mxu1 %v1315_v32  ;;  %v1508_v32 = vld [vmem:[#allocation3 + $0x18] sm:$0xff] }
 0x2cf   : > { %2046 = vmatpush3.bf16.msra.mxu0 %v2369_v15 }
 0x2d0   : > { %2047 = vmatprep.subr.bf16.mxu0 %v2370_v26 }
 0x2d1   : > { %1331 = vmatpush1.bf16.msra.mxu1 %v1314_v33  ;;  %v1517_v33 = vld [vmem:[#allocation3 + $0x60] sm:$0xff] }
 0x2d2   : > { %1332 = vmatprep.subr.bf16.mxu1 %v1317_v46 }
 0x2d3   : > { %2048 = vmatpush3.bf16.msra.mxu0 %v2370_v26 }
 0x2d4   : > { %2049 = vmatprep.subr.bf16.mxu0 %v2371_v52 }
 0x2d5   : > { %1333 = vmatpush1.bf16.msra.mxu1 %v1316_v19 }
 0x2d6   : > { %1334 = vmatprep.subr.bf16.mxu1 %v1319_v20 }
 0x2d7   : > { %2050 = vmatpush3.bf16.msra.mxu0 %v2371_v52 }
 0x2d8   : > { %1899 = vmatprep.subr.bf16.mxu0 %v1513_v43 }
 0x2d9   : > { %1335 = vmatpush1.bf16.msra.mxu1 %v1318_v27 }
 0x2da   : > { %2052 = vmatmul.mubr.bf16.vlgmr.msra.gmra.mrb[0].mxu0 %v1161_v22  ;;  %2059 = vmatprep.subr.bf16.mxu1 %v1513_v43 }
 0x2db   : > { %2055 = vmatprep.mubr.bf16.mxu0 %v1162_v34  ;;  %1900 = vmatpush3.bf16.msra.mxu0 %v1505_v4 }
 0x2dc   : > { %1901 = vmatprep.subr.bf16.mxu0 %v1514_v7 }
 0x2df   : > { %1902 = vmatpush3.bf16.msra.mxu0 %v1506_v8 }
 0x2e0   : > { %1903 = vmatprep.subr.bf16.mxu0 %v1515_v9 }
 0x2e2   : > { %2056 = vmatmul.mubr.bf16.gmra.mrb[4].mxu0 %v1163_v39  ;;  %v1509_v39 = vld [vmem:[#allocation3 + $0x20] sm:$0xff] }
 0x2e3   : > { %1904 = vmatpush3.bf16.msra.mxu0 %v1507_v10 }
 0x2e4   : > { %1905 = vmatprep.subr.bf16.mxu0 %v1516_v55 }
 0x2e7   : > { %1906 = vmatpush3.bf16.msra.mxu0 %v1508_v32 }
 0x2e8   : > { %1907 = vmatprep.subr.bf16.mxu0 %v1517_v33 }
 0x2eb   : > { %1908 = vmatpush3.bf16.msra.mxu0 %v1509_v39 }
 0x3ad   : > { %v2053_v49 = vpop.f32.mrb[0].mxu0 }
 0x3ae   : > { %v1269_v53 = vpop.f32.mrb[1].mxu0  ;;  %v1278_v41 = vadd.f32 %v2053_v49, %v1823_v51  ;;  %v1510_v49 = vld [vmem:[#allocation3 + $0x28] sm:$0xff] }
 0x3af   : > { %v2054_v56 = vpop.f32.mrb[2].mxu0  ;;  %v1270_v37 = vadd.f32 %v1823_v51, %v1269_v53  ;;  %v1511_v53 = vld [vmem:[#allocation3 + $0x30] sm:$0xff] }
 0x3b0   : > { %v1281_v58 = vadd.f32 %v2054_v56, %v1823_v51  ;;  %v1272_v59 = vpop.f32.mrb[3].mxu0  ;;  %v1520_v56 = vld [vmem:[#allocation3 + $0x78] sm:$0xff] }
 0x3b1   : > { %v1273_v38 = vadd.f32 %v1823_v51, %v1272_v59 }
 0x3b2   : > { %v1301_v57 = vpack.c.bf16 %v1281_v58, %v1278_v41  ;;  %v1512_v41 = vld [vmem:[#allocation3 + $0x38] sm:$0xff] }
 0x3b3   : > { %v1300_v60 = vpack.c.bf16 %v1273_v38, %v1270_v37 }
 0x3b5   : > { %1353 = vmatmul.mubr.bf16.vlgmr.msra.gmra.mrb[0].mxu1 %v1300_v60  ;;  %v2057_v61 = vpop.f32.mrb[4].mxu0 }
 0x3b6   : > { %v1294_v62 = vadd.f32 %v2057_v61, %v1823_v51  ;;  %v1285_v63 = vpop.f32.mrb[5].mxu0  ;;  %1362 = vmatprep.mubr.bf16.mxu1 %v2709_v48  ;;  %2067 = vmatpush3.bf16.msra.mxu1 %v1505_v4 }
 0x3b7   : > { %v1286_v0 = vadd.f32 %v1823_v51, %v1285_v63  ;;  %v2058_v1 = vpop.f32.mrb[6].mxu0  ;;  %2060 = vmatprep.subr.bf16.mxu1 %v1514_v7 }
 0x3b8   : > { %v1297_v54 = vadd.f32 %v2058_v1, %v1823_v51  ;;  %v1288_v40 = vpop.f32.mrb[7].mxu0 }
 0x3b9   : > { %v1289_v42 = vadd.f32 %v1823_v51, %v1288_v40  ;;  %v1519_v51 = vld [vmem:[#allocation3 + $0x70] sm:$0xff] }
 0x3ba   : > { %v1303_v2 = vpack.c.bf16 %v1297_v54, %v1294_v62  ;;  %2068 = vmatpush3.bf16.msra.mxu1 %v1506_v8 }
 0x3bb   : > { %v1302_v3 = vpack.c.bf16 %v1289_v42, %v1286_v0  ;;  %2061 = vmatprep.subr.bf16.mxu1 %v1515_v9 }
 0x3bd   : > { %1363 = vmatmul.mubr.bf16.gmra.mrb[4].mxu1 %v1301_v57 }
 0x3be   : > { %1372 = vmatprep.mubr.bf16.mxu1 %v2709_v48  ;;  %2069 = vmatpush3.bf16.msra.mxu1 %v1507_v10 }
 0x3bf   : > { %2062 = vmatprep.subr.bf16.mxu1 %v1516_v55 }
 0x3c2   : > { %2070 = vmatpush3.bf16.msra.mxu1 %v1508_v32 }
 0x3c3   : > { %2063 = vmatprep.subr.bf16.mxu1 %v1517_v33 }
 0x3c5   : > { %1373 = vmatmul.mubr.bf16.gmra.mrb[8].mxu1 %v1302_v3 }
 0x3c6   : > { %1382 = vmatprep.mubr.bf16.mxu1 %v2709_v48  ;;  %2071 = vmatpush3.bf16.msra.mxu1 %v1509_v39  ;;  %v1518_v48 = vld [vmem:[#allocation3 + $0x68] sm:$0xff] }
 0x3c7   : > { %1909 = vmatprep.subr.bf16.mxu0 %v1518_v48  ;;  %2064 = vmatprep.subr.bf16.mxu1 %v1518_v48 }
 0x3c8   : > { %1910 = vmatpush3.bf16.msra.mxu0 %v1510_v49 }
 0x3c9   : > { %1911 = vmatprep.subr.bf16.mxu0 %v1519_v51 }
 0x3ca   : > { %2072 = vmatpush3.bf16.msra.mxu1 %v1510_v49 }
 0x3cb   : > { %2065 = vmatprep.subr.bf16.mxu1 %v1519_v51 }
 0x3cc   : > { %1912 = vmatpush3.bf16.msra.mxu0 %v1511_v53 }
 0x3cd   : > { %1383 = vmatmul.mubr.bf16.gmra.mrb[12].mxu1 %v1303_v2  ;;  %1913 = vmatprep.subr.bf16.mxu0 %v1520_v56 }
 0x3ce   : > { %2073 = vmatpush3.bf16.msra.mxu1 %v1511_v53 }
 0x3cf   : > { %2066 = vmatprep.subr.bf16.mxu1 %v1520_v56 }
 0x3d0   : > { %1914 = vmatpush3.bf16.msra.mxu0 %v1512_v41 }
 0x3d2   : > { %2074 = vmatpush3.bf16.msra.mxu1 %v1512_v41 }
 0x488   : > { %v3309_v5 = vpop.f32.mrb[0].mxu1 }
 0x489   : > { %v3311_v6 = vpop.f32.mrb[1].mxu1 }
 0x48a   : > { %v3313_v11 = vpop.f32.mrb[2].mxu1  ;;  %v1393_v14 = vmax.f32 %v3309_v5, %v3311_v6 }
 0x48b   : > { %v3317_v47 = vpop.f32.mrb[3].mxu1 }
 0x48c   : > { %1394 = vmax.xlane.f32.xlu0 %v1393_v14  ;;  %v1396_v18 = vmax.f32 %v3313_v11, %v3317_v47 }
 0x490   : > { %1397 = vmax.xlane.f32.xlu0 %v1396_v18  ;;  %v3321_v21 = vpop.f32.mrb[4].mxu1 }
 0x491   : > { %v3323_v44 = vpop.f32.mrb[5].mxu1 }
 0x492   : > { %v3325_v23 = vpop.f32.mrb[6].mxu1  ;;  %v1399_v24 = vmax.f32 %v3321_v21, %v3323_v44 }
 0x493   : > { %v3329_v25 = vpop.f32.mrb[7].mxu1 }
 0x494   : > { %1400 = vmax.xlane.f32.xlu0 %v1399_v24  ;;  %v1402_v15 = vmax.f32 %v3325_v23, %v3329_v25 }
 0x498   : > { %v3333_v45 = vpop.f32.mrb[8].mxu1 }
 0x499   : > { %v3335_v50 = vpop.f32.mrb[9].mxu1 }
 0x49a   : > { %v3337_v26 = vpop.f32.mrb[10].mxu1  ;;  %v1405_v28 = vmax.f32 %v3333_v45, %v3335_v50 }
 0x49b   : > { %v3341_v29 = vpop.f32.mrb[11].mxu1 }
 0x49c   : > { %1406 = vmax.xlane.f32.xlu1 %v1405_v28  ;;  %v1408_v52 = vmax.f32 %v3337_v26, %v3341_v29 }
 0x4a0   : > { %1409 = vmax.xlane.f32.xlu1 %v1408_v52  ;;  %v3345_v22 = vpop.f32.mrb[12].mxu1 }
 0x4a1   : > { %v3347_v34 = vpop.f32.mrb[13].mxu1 }
 0x4a2   : > { %v3349_v46 = vpop.f32.mrb[14].mxu1  ;;  %v1411_v19 = vmax.f32 %v3345_v22, %v3347_v34 }
 0x4a3   : > { %v3353_v20 = vpop.f32.mrb[15].mxu1 }
 0x4a4   : > { %1403 = vmax.xlane.f32.xlu1 %v1402_v15  ;;  %1412 = vmax.xlane.f32.xlu0 %v1411_v19  ;;  %v1414_v27 = vmax.f32 %v3349_v46, %v3353_v20 }
 0x4a8   : > { %1415 = vmax.xlane.f32.xlu1 %v1414_v27 }
 0x519   : > { %v1395_v58 = vpop.xlane.xlu0 %1394 }
 0x51a   : > { %v1417_v59 = vsub.f32 %v3309_v5, %v1395_v58  ;;  %v1418_v37 = vsub.f32 %v3311_v6, %v1395_v58 }
 0x51c   : > { %v1433_v38 = vmul.f32 1.442695, %v1417_v59  ;;  %v1435_v57 = vmul.f32 1.442695, %v1418_v37 }
 0x51d   : > { %v1398_v60 = vpop.xlane.xlu0 %1397 }
 0x51e   : > { %2372 = vpow2.f32 %v1433_v38  ;;  %v1419_v61 = vsub.f32 %v3313_v11, %v1398_v60  ;;  %v1420_v62 = vsub.f32 %v3317_v47, %v1398_v60 }
 0x51f   : > { %2374 = vpow2.f32 %v1435_v57 }
 0x520   : > { %v1437_v63 = vmul.f32 1.442695, %v1419_v61  ;;  %v1439_v0 = vmul.f32 1.442695, %v1420_v62 }
 0x521   : > { %v1401_v1 = vpop.xlane.xlu0 %1400 }
 0x522   : > { %2376 = vpow2.f32 %v1437_v63  ;;  %v1421_v54 = vsub.f32 %v3321_v21, %v1401_v1  ;;  %v1422_v40 = vsub.f32 %v3323_v44, %v1401_v1 }
 0x523   : > { %2378 = vpow2.f32 %v1439_v0 }
 0x524   : > { %v1441_v42 = vmul.f32 1.442695, %v1421_v54  ;;  %v1443_v2 = vmul.f32 1.442695, %v1422_v40 }
 0x526   : > { %2380 = vpow2.f32 %v1441_v42 }
 0x527   : > { %2382 = vpow2.f32 %v1443_v2 }
 0x528   : > { %v2373_v3 = vpop.eup %2372 }
 0x529   : > { %v2375_v43 = vpop.eup %2374  ;;  %v1407_v4 = vpop.xlane.xlu1 %1406 }
 0x52a   : > { %v1425_v7 = vsub.f32 %v3333_v45, %v1407_v4  ;;  %v1426_v8 = vsub.f32 %v3335_v50, %v1407_v4  ;;  %v1465_v9 = vadd.f32 %v2375_v43, %v2373_v3 }
 0x52c   : > { %v2377_v10 = vpop.eup %2376  ;;  %v1449_v5 = vmul.f32 1.442695, %v1425_v7  ;;  %v1451_v6 = vmul.f32 1.442695, %v1426_v8  ;;  %1466 = vadd.xlane.f32.xlu0 %v1465_v9 }
 0x52d   : > { %v2379_v11 = vpop.eup %2378  ;;  %v1410_v14 = vpop.xlane.xlu1 %1409  ;;  %v1497_v47 = vpack.c.bf16 %v2377_v10, %v2373_v3 }
 0x52e   : > { %2384 = vpow2.f32 %v1449_v5  ;;  %v1427_v18 = vsub.f32 %v3337_v26, %v1410_v14  ;;  %v1428_v21 = vsub.f32 %v3341_v29, %v1410_v14  ;;  %v1498_v44 = vpack.c.bf16 %v2379_v11, %v2375_v43 }
 0x52f   : > { %2386 = vpow2.f32 %v1451_v6  ;;  %v1468_v24 = vadd.f32 %v2379_v11, %v2377_v10 }
 0x530   : > { %v2381_v15 = vpop.eup %2380  ;;  %v1453_v45 = vmul.f32 1.442695, %v1427_v18  ;;  %v1455_v28 = vmul.f32 1.442695, %v1428_v21  ;;  %1553 = vmatprep.mubr.bf16.mxu0 %v1498_v44 }
 0x531   : > { %v2383_v50 = vpop.eup %2382  ;;  %1469 = vadd.xlane.f32.xlu1 %v1468_v24  ;;  %1554 = vmatmul.mubr.bf16.vlgmr.msra.gmra.mrb[8].mxu0 %v1497_v47  ;;  %v1404_v52 = vpop.xlane.xlu1 %1403 }
 0x532   : > { %v1413_v55 = vpop.xlane.xlu0 %1412  ;;  %2388 = vpow2.f32 %v1453_v45  ;;  %v1423_v32 = vsub.f32 %v3325_v23, %v1404_v52  ;;  %v1424_v33 = vsub.f32 %v3329_v25, %v1404_v52  ;;  %v1471_v39 = vadd.f32 %v2383_v50, %v2381_v15 }
 0x533   : > { %v1429_v26 = vsub.f32 %v3345_v22, %v1413_v55  ;;  %2390 = vpow2.f32 %v1455_v28  ;;  %v1430_v29 = vsub.f32 %v3347_v34, %v1413_v55 }
 0x534   : > { %v1445_v19 = vmul.f32 1.442695, %v1423_v32  ;;  %v1447_v27 = vmul.f32 1.442695, %v1424_v33  ;;  %1472 = vadd.xlane.f32.xlu0 %v1471_v39 }
 0x535   : > { %v1457_v48 = vmul.f32 1.442695, %v1429_v26  ;;  %v1459_v49 = vmul.f32 1.442695, %v1430_v29  ;;  %v1416_v51 = vpop.xlane.xlu1 %1415 }
 0x536   : > { %2392 = vpow2.f32 %v1445_v19  ;;  %v1431_v53 = vsub.f32 %v3349_v46, %v1416_v51  ;;  %v1432_v56 = vsub.f32 %v3353_v20, %v1416_v51 }
 0x537   : > { %2394 = vpow2.f32 %v1447_v27 }
 0x538   : > { %v2385_v23 = vpop.eup %2384  ;;  %2396 = vpow2.f32 %v1457_v48  ;;  %v1461_v25 = vmul.f32 1.442695, %v1431_v53  ;;  %v1463_v22 = vmul.f32 1.442695, %v1432_v56 }
 0x539   : > { %v2387_v41 = vpop.eup %2386  ;;  %2398 = vpow2.f32 %v1459_v49 }
 0x53a   : > { %2400 = vpow2.f32 %v1461_v25  ;;  %v1477_v34 = vadd.f32 %v2387_v41, %v2385_v23 }
 0x53b   : > { %2402 = vpow2.f32 %v1463_v22 }
 0x53c   : > { %v2389_v58 = vpop.eup %2388  ;;  %1478 = vadd.xlane.f32.xlu0 %v1477_v34 }
 0x53d   : > { %v2391_v59 = vpop.eup %2390  ;;  %v1501_v37 = vpack.c.bf16 %v2389_v58, %v2385_v23 }
 0x53e   : > { %v1502_v38 = vpack.c.bf16 %v2391_v59, %v2387_v41  ;;  %v1480_v57 = vadd.f32 %v2391_v59, %v2389_v58 }
 0x540   : > { %v2393_v60 = vpop.eup %2392  ;;  %1569 = vmatprep.mubr.bf16.mxu1 %v1502_v38 }
 0x541   : > { %v2395_v46 = vpop.eup %2394  ;;  %1570 = vmatmul.mubr.bf16.vlgmr.msra.gmra.mrb[16].mxu1 %v1501_v37  ;;  %v1499_v20 = vpack.c.bf16 %v2393_v60, %v2381_v15 }
 0x542   : > { %v2397_v61 = vpop.eup %2396  ;;  %v1500_v62 = vpack.c.bf16 %v2395_v46, %v2383_v50  ;;  %v1474_v63 = vadd.f32 %v2395_v46, %v2393_v60 }
 0x543   : > { %v2399_v0 = vpop.eup %2398 }
 0x544   : > { %v2401_v1 = vpop.eup %2400  ;;  %1561 = vmatprep.mubr.bf16.mxu0 %v1500_v62  ;;  %v1483_v54 = vadd.f32 %v2399_v0, %v2397_v61  ;;  %1475 = vadd.xlane.f32.xlu1 %v1474_v63 }
 0x545   : > { %v2403_v40 = vpop.eup %2402  ;;  %1562 = vmatmul.mubr.bf16.gmra.mrb[12].mxu0 %v1499_v20  ;;  %v1503_v42 = vpack.c.bf16 %v2401_v1, %v2397_v61 }
 0x546   : > { %1484 = vadd.xlane.f32.xlu0 %v1483_v54  ;;  %v1504_v2 = vpack.c.bf16 %v2403_v40, %v2399_v0  ;;  %v1486_v3 = vadd.f32 %v2403_v40, %v2401_v1 }
 0x548   : > { %1481 = vadd.xlane.f32.xlu1 %v1480_v57  ;;  %1577 = vmatprep.mubr.bf16.mxu1 %v1504_v2 }
 0x549   : > { %1578 = vmatmul.mubr.bf16.gmra.mrb[20].mxu1 %v1503_v42 }
 0x54c   : > { %1487 = vadd.xlane.f32.xlu1 %v1486_v3 }
 0x5b9   : > { %v1467_v43 = vpop.xlane.xlu0 %1466 }
 0x5ba   : > { %2404 = vrcp.f32 %v1467_v43 }
 0x5be   : > { %v1470_v4 = vpop.xlane.xlu1 %1469 }
 0x5bf   : > { %2406 = vrcp.f32 %v1470_v4 }
 0x5c1   : > { %v1473_v8 = vpop.xlane.xlu0 %1472 }
 0x5c4   : > { %v2405_v11 = vpop.eup %2404 }
 0x5c9   : > { %v2407_v21 = vpop.eup %2406  ;;  %v1479_v44 = vpop.xlane.xlu0 %1478 }
 0x5ca   : > { %2408 = vrcp.f32 %v1479_v44 }
 0x5d1   : > { %v1476_v10 = vpop.xlane.xlu1 %1475 }
 0x5d3   : > { %v1485_v50 = vpop.xlane.xlu0 %1484 }
 0x5d5   : > { %v1482_v45 = vpop.xlane.xlu1 %1481 }
 0x5d6   : > { %2410 = vrcp.f32 %v1482_v45 }
 0x5d7   : > { %2412 = vrcp.f32 %v1473_v8 }
 0x5d8   : > { %2414 = vrcp.f32 %v1476_v10 }
 0x5d9   : > { %v1488_v52 = vpop.xlane.xlu1 %1487  ;;  %2416 = vrcp.f32 %v1485_v50 }
 0x5da   : > { %2418 = vrcp.f32 %v1488_v52 }
 0x604   : > { %v1915_v7 = vpop.f32.mrb[8].mxu0 }
 0x605   : > { %v1916_v9 = vpop.f32.mrb[9].mxu0 }
 0x606   : > { %v1917_v5 = vadd.f32 %v1916_v9, %v1915_v7  ;;  %v1918_v6 = vpop.f32.mrb[10].mxu0 }
 0x607   : > { %v1919_v14 = vpop.f32.mrb[11].mxu0 }
 0x608   : > { %v1586_v47 = vmul.f32 %v2405_v11, %v1917_v5  ;;  %v1920_v18 = vadd.f32 %v1919_v14, %v1918_v6 }
 0x60a   : > { %v1594_v24 = vadd.f32 %v1586_v47, %v3275_v16  ;;  %v1587_v15 = vmul.f32 %v2407_v21, %v1920_v18  ;;  %v2409_v16 = vpop.eup %2408 }
 0x60b   : > { %v2411_v27 = vpop.eup %2410 }
 0x60c   : > { %1602 = vst [vmem:[%s3103_s18] sm:$0xff] %v1594_v24  ;;  %v1595_v28 = vadd.f32 %v1587_v15, %v3278_v17  ;;  %v2413_v23 = vpop.eup %2412 }
 0x60d   : > { %v2415_v59 = vpop.eup %2414 }
 0x60e   : > { %1603 = vst [vmem:[%s3103_s18 + $0x8] sm:$0xff] %v1595_v28  ;;  %v2417_v46 = vpop.eup %2416 }
 0x60f   : > { %v2419_v63 = vpop.eup %2418 }
 0x614   : > { %v1927_v55 = vpop.f32.mrb[16].mxu1 }
 0x615   : > { %v1928_v32 = vpop.f32.mrb[17].mxu1 }
 0x616   : > { %v1929_v33 = vadd.f32 %v1928_v32, %v1927_v55  ;;  %v1930_v26 = vpop.f32.mrb[18].mxu1 }
 0x617   : > { %v1931_v29 = vpop.f32.mrb[19].mxu1 }
 0x618   : > { %v1590_v39 = vmul.f32 %v2409_v16, %v1929_v33  ;;  %v1932_v17 = vadd.f32 %v1931_v29, %v1930_v26  ;;  %v1921_v19 = vpop.f32.mrb[12].mxu0 }
 0x619   : > { %v1922_v48 = vpop.f32.mrb[13].mxu0 }
 0x61a   : > { %v1598_v49 = vadd.f32 %v1590_v39, %v3289_v12  ;;  %v1591_v51 = vmul.f32 %v2411_v27, %v1932_v17  ;;  %v1923_v53 = vadd.f32 %v1922_v48, %v1921_v19  ;;  %v1924_v56 = vpop.f32.mrb[14].mxu0 }
 0x61b   : > { %v1925_v25 = vpop.f32.mrb[15].mxu0 }
 0x61c   : > { %1606 = vst [vmem:[%s3103_s18 + $0x20] sm:$0xff] %v1598_v49  ;;  %v1599_v22 = vadd.f32 %v1591_v51, %v3292_v13  ;;  %v1588_v41 = vmul.f32 %v2413_v23, %v1923_v53  ;;  %v1926_v34 = vadd.f32 %v1925_v25, %v1924_v56  ;;  %v1933_v58 = vpop.f32.mrb[20].mxu1 }
 0x61d   : > { %v1934_v37 = vpop.f32.mrb[21].mxu1 }
 0x61e   : > { %1607 = vst [vmem:[%s3103_s18 + $0x28] sm:$0xff] %v1599_v22  ;;  %v1596_v12 = vadd.f32 %v1588_v41, %v3283_v30  ;;  %v1589_v38 = vmul.f32 %v2415_v59, %v1926_v34  ;;  %v1935_v57 = vadd.f32 %v1934_v37, %v1933_v58  ;;  %v1936_v60 = vpop.f32.mrb[22].mxu1 }
 0x61f   : > { %v1937_v20 = vpop.f32.mrb[23].mxu1 }
 0x620   : > { %1604 = vst [vmem:[%s3103_s18 + $0x10] sm:$0xff] %v1596_v12  ;;  %v1597_v13 = vadd.f32 %v1589_v38, %v3286_v31  ;;  %v1592_v61 = vmul.f32 %v2417_v46, %v1935_v57  ;;  %v1938_v62 = vadd.f32 %v1937_v20, %v1936_v60 }
 0x622   : > { %1605 = vst [vmem:[%s3103_s18 + $0x18] sm:$0xff] %v1597_v13  ;;  %v1600_v30 = vadd.f32 %v1592_v61, %v3299_v35  ;;  %v1593_v0 = vmul.f32 %v2419_v63, %v1938_v62 }
 0x624   : > { %1608 = vst [vmem:[%s3103_s18 + $0x30] sm:$0xff] %v1600_v30  ;;  %v1601_v31 = vadd.f32 %v1593_v0, %v3302_v36 }
 0x626   : > { %1609 = vst [vmem:[%s3103_s18 + $0x38] sm:$0xff] %v1601_v31 }
 0x627   : > { %2577 = shalt.err (!%p2574_p3)
}
 0x628   : > { %s2578_s18 = scalar_lea.hbm %s3392_s24, 1024  ;;  %s2582_s25 = scalar_lea.hbm %s3530_s8, 8192 }
 0x629   : > { %p2579_p13 = scmp.ne.s32.totalorder %s3392_s24, %s2578_s18  ;;  %p2583_p9 = scmp.lt.u32.totalorder %s3392_s24, %s3530_s8 }
 0x62a   : > { %p2584_p1 = scmp.lt.u32.totalorder %s2582_s25, %s2578_s18  ;;  %p2586_p12 = scmp.lt.u32.totalorder %s2578_s18, %s3392_s24 }
 0x62b   : > { %p2580_p0 = pnand %p2579_p13, %p2949_p5 }
 0x62c   : > { %p2585_p4 = por %p2584_p1, %p2583_p9 }
 0x62d   : > { %p2581_p7 = pneg %p2580_p0 }
 0x62e   : > { %p2587_p2 = por %p2586_p12, %p2585_p4 }
 0x630   : > { %p2588_p10 = pnand %p2587_p2, %p2581_p7 }
 0x632   : > { %2591 = shalt.err (!%p2588_p10)
}
 0x633   : > { %s2711_s16 = smov 128   ;;  %s2712_s20 = smov 8  }
 0x634   : > { %2091 = dma.vmem_to_hbm [thread:$0]  (%p2949_p5), %s3394_s2, 1024, %s3392_s24, %s1611_s30, %s2711_s16, %s2711_s16, %s2712_s20  }
 0x635 PF: > { %s3531_s27 = sld [smem:[#allocation19_spill]]  ;;  %s3532_s11 = sld [smem:[#allocation23_spill]] }
 0x636   : > { %p2121_p6 = scmp.ge.s32.totalorder %s2698_s15, 2 }
 0x63b   : > { %s1641_s4 = sand.u32 1, %s3531_s27   ;;  %p3533_p8 = scmp.ne.s32.totalorder %s3532_s11, 0 }
 0x63c   : > { %s1642_s23 = scalar_lea.sflag [#allocation6], %s1641_s4 }
 0x63d   : > { %p2111_p11 = pnand %p2121_p6, %p3533_p8 }
 0x63f   : > { %2653 = dma.done.wait (!%p2111_p11), %s1642_s23, 1024  }
 0x640   : > { %2655 = vsyncadd (!%p2111_p11), %s1642_s23, 4294966272  ;;  %s28_s15 = sadd.s32 1, %s2698_s15   ;;  %s3534_s19 = sld [smem:[#allocation24_spill]] }
 0x641   : > { %p25_p3 = scmp.ge.s32.totalorder %s28_s15, 10   ;;  %s3535_s27 = smov %s2662_s28 }
 0x642   : > { %s3536_s28 = smov %s2666_s29  ;;  %s3537_s29 = smov %s3024_s6 }
 0x643   : > { %s3538_s30 = smov %s2674_s9  ;;  %s3539_s9 = smov %s2678_s10 }
 0x644   : > { %s3540_s10 = smov %s2972_s26  ;;  %s3541_s11 = smov %s2690_s13 }
 0x645   : > { %s3542_s12 = smov %s2694_s14  ;;  %s3543_s13 = smov %s3546_s3 }
 0x646   : > { %s3544_s14 = smov %s3534_s19  ;;  %27 = sbr.rel (!%p25_p3) target bundleno = 20 (0x14), region = 126 }
 0x64d   :  { %1647 = vsyncpa [#allocation5], 1 }
 0x64e   :  { %1649 = vsyncpa [#allocation5 + $0x1], 1 }
 0x64f   :  { %1650 = vsyncpa [#allocation8], 1 }
 0x650   :  { %1652 = vsyncpa [#allocation8 + $0x1], 1 }
 0x651   :  { %1653 = vsyncpa [#allocation11], 1 }
 0x652   :  { %1654 = vsyncpa [#allocation6], 1 }
 0x653   :  { %1656 = vsyncpa [#allocation6 + $0x1], 1 }

</bundles_post_ra>
